<compile_context>
chip_gen: v6e
topology: v6e:2x2x1
jax: 0.10.0
libtpu: 0.0.40
codegen_flags: <defaults>
</compile_context>

<pallas_src>
import jax
import jax.numpy as jnp
from jax.experimental import pallas as pl
from jax.experimental.pallas import tpu as pltpu

# Model hyperparameters (match the PyTorch module).
N_FEATURES = 4
SEQ_LEN = 8
N_HIDDEN = 64
N_HIDDEN2 = 32
FUTURE_TIME_AS_INPUT = 1  # only the config['future_time_as_input'] == 1 path is implemented


def mv_lstm_supervised_kernel(
    xf_ref,      # (bm, S*F)        flattened input block, f32
    time_ref,    # (bm, 1)          f32
    wcx_ref,     # (S*F, S*F)       linear_combine weight (x part), transposed, bf16
    wct_ref,     # (1, S*F)         linear_combine weight (time column), f32 (VPU)
    bc_ref,      # (1, S*F)         linear_combine bias, f32
    wih1b_ref,   # (S*F, S*4*H1)    block-diag LSTM1 W_ih^T, g-cols x2, bf16
    whh1_ref,    # (H1, 4*H1)       LSTM1 W_hh^T, g-cols x2, bf16
    w2_ref,      # (H1+H2, 4*H2)    fused LSTM2 [W_ih^T; W_hh^T], g-cols x2, bf16
    b2_ref,      # (1, 4*H2)        LSTM2 b_ih + b_hh, g-cols x2, f32
    wfin_ref,    # (S, H2)          final linear weight reshaped per-step, f32 (VPU)
    bfin_ref,    # (1, 1)           final linear bias, f32
    out_ref,     # (bm, 1)          f32
):
    B = xf_ref.shape[0]
    S, F, H1, H2 = SEQ_LEN, N_FEATURES, N_HIDDEN, N_HIDDEN2
    G1, G2 = 4 * H1, 4 * H2

    xf = xf_ref[...]                                   # (B, S*F) f32

    if FUTURE_TIME_AS_INPUT == 1:
        # linear_combine on cat([x_flat, time]) == x_flat @ Wx + time_col + b.
        # Time column is a rank-1 VPU broadcast, not a K=1 MXU matmul.
        t = time_ref[...]                              # (B, 1)
        combined = (
            jnp.dot(xf.astype(jnp.bfloat16), wcx_ref[...],
                    preferred_element_type=jnp.float32)
            + t * wct_ref[...]
            + bc_ref[...]
        )
        xf = jnp.maximum(combined, 0.0)                # ReLU, f32

    # Hoisted LSTM1 input projection for ALL time steps in one matmul.
    xproj = jnp.dot(xf.astype(jnp.bfloat16), wih1b_ref[...],
                    preferred_element_type=jnp.float32)        # (B, S*4*H1) f32

    whh1 = whh1_ref[...]
    w2 = w2_ref[...]
    # Hoist the bias broadcast: the unrolled loop would re-emit broadcast_in_dim
    # per step otherwise (JAX does not CSE it).
    b2b = jnp.broadcast_to(b2_ref[...], (B, G2))       # (B, 4*H2) f32
    wfin = wfin_ref[...]                               # (S, H2) f32

    h1 = jnp.zeros((B, H1), jnp.float32)
    c1 = jnp.zeros((B, H1), jnp.float32)
    h2 = jnp.zeros((B, H2), jnp.float32)
    c2 = jnp.zeros((B, H2), jnp.float32)
    fin_acc = jnp.zeros((B, H2), jnp.float32)

    # Gate trick (exact): weights/bias of the cell ('g') gate columns are
    # pre-scaled by 2, so one full-width a = tanh(0.5*g) gives
    #   i/f/o = 0.5*a + 0.5  (== sigmoid of the original pre-activation)
    #   g_cell = a           (== tanh of the original pre-activation)
    for step in range(S):  # statically unrolled time recurrence
        # ---- LSTM1 (bias=False): only h @ W_hh is per-step ----
        g1 = xproj[:, step * G1:(step + 1) * G1] + jnp.dot(
            h1.astype(jnp.bfloat16), whh1, preferred_element_type=jnp.float32)
        a1 = jnp.tanh(0.5 * g1)                        # one EUP push for all 4 gates
        i1 = 0.5 * a1[:, 0 * H1:1 * H1] + 0.5
        f1 = 0.5 * a1[:, 1 * H1:2 * H1] + 0.5
        gg1 = a1[:, 2 * H1:3 * H1]
        o1 = 0.5 * a1[:, 3 * H1:4 * H1] + 0.5
        c1 = f1 * c1 + i1 * gg1
        h1 = o1 * jnp.tanh(c1)

        # ---- LSTM2: single fused K=96 matmul on [h1 | h2] ----
        h12 = jnp.concatenate([h1, h2], axis=1).astype(jnp.bfloat16)   # (B, H1+H2)
        g2 = jnp.dot(h12, w2, preferred_element_type=jnp.float32) + b2b
        a2 = jnp.tanh(0.5 * g2)
        i2 = 0.5 * a2[:, 0 * H2:1 * H2] + 0.5
        f2 = 0.5 * a2[:, 1 * H2:2 * H2] + 0.5
        gg2 = a2[:, 2 * H2:3 * H2]
        o2 = 0.5 * a2[:, 3 * H2:4 * H2] + 0.5
        c2 = f2 * c2 + i2 * gg2
        h2 = o2 * jnp.tanh(c2)

        # ---- final linear, accumulated per-lane (no per-step XLU reduce) ----
        fin_acc = fin_acc + h2 * wfin[step:step + 1, :]

    # Single cross-lane reduce, off the recurrence chain.
    out_ref[...] = jnp.sum(fin_acc, axis=-1, keepdims=True) + bfin_ref[...]


def make_params(key):
    """Deterministic parameter init matching PyTorch shapes (uniform(-k, k))."""
    S, F, H1, H2 = SEQ_LEN, N_FEATURES, N_HIDDEN, N_HIDDEN2
    SF = S * F

    def unif(k, shape, bound):
        return jax.random.uniform(k, shape, jnp.float32, -bound, bound)

    keys = jax.random.split(key, 10)
    kc = 1.0 / jnp.sqrt(SF + 1.0)
    k1 = 1.0 / jnp.sqrt(float(H1))
    k2 = 1.0 / jnp.sqrt(float(H2))
    kf = 1.0 / jnp.sqrt(float(S * H2))

    return dict(
        w_combine=unif(keys[0], (SF, SF + 1), kc),   # linear_combine weight
        b_combine=unif(keys[1], (SF,), kc),
        w_ih1=unif(keys[2], (4 * H1, F), k1),        # LSTM1 (bias=False)
        w_hh1=unif(keys[3], (4 * H1, H1), k1),
        w_ih2=unif(keys[4], (4 * H2, H1), k2),       # LSTM2
        w_hh2=unif(keys[5], (4 * H2, H2), k2),
        b_ih2=unif(keys[6], (4 * H2,), k2),
        b_hh2=unif(keys[7], (4 * H2,), k2),
        w_fin=unif(keys[8], (1, S * H2), kf),        # final linear
        b_fin=unif(keys[9], (1,), kf),
    )


def _scale_cell_gate_cols(w, H):
    """Double the cell-gate ('g') columns so tanh(0.5*g) covers all gates exactly
    (sigmoid(x) = 0.5*tanh(x/2) + 0.5 for i/f/o; tanh(x) for g). Power-of-2
    scaling is exact in bf16."""
    scale = jnp.ones((4 * H,), jnp.float32).at[2 * H:3 * H].set(2.0)
    return w * scale


def prepare_params(params):
    """One-time weight prep (transpose / fuse / scale / bf16 cast). Call ONCE,
    outside the per-call jit path — the kernel itself is microseconds-scale."""
    S, F, H1, H2 = SEQ_LEN, N_FEATURES, N_HIDDEN, N_HIDDEN2
    SF = S * F
    G1 = 4 * H1

    wc_t = jnp.transpose(params["w_combine"])                      # (SF+1, SF)

    wih1_t = _scale_cell_gate_cols(jnp.transpose(params["w_ih1"]), H1)   # (F, 4*H1)
    whh1_t = _scale_cell_gate_cols(jnp.transpose(params["w_hh1"]), H1)   # (H1, 4*H1)

    # Block-diagonal (S*F, S*4*H1): xf @ wih1_blk computes the LSTM1 input
    # projection for every time step in a single matmul.
    eye_s = jnp.eye(S, dtype=jnp.float32)
    wih1_blk = jnp.einsum("st,fg->sftg", eye_s, wih1_t).reshape(SF, S * G1)

    # Fused LSTM2 weight: g2 = [h1 | h2] @ w2 + b2 (one K=H1+H2 matmul per step).
    w2 = jnp.concatenate([jnp.transpose(params["w_ih2"]),
                          jnp.transpose(params["w_hh2"])], axis=0)  # (H1+H2, 4*H2)
    w2 = _scale_cell_gate_cols(w2, H2)
    b2 = _scale_cell_gate_cols(params["b_ih2"] + params["b_hh2"], H2)

    return dict(
        wcx=wc_t[:SF, :].astype(jnp.bfloat16),              # (SF, SF)
        wct=wc_t[SF:, :].astype(jnp.float32),               # (1, SF)
        bc=params["b_combine"].reshape(1, SF).astype(jnp.float32),
        wih1_blk=wih1_blk.astype(jnp.bfloat16),             # (SF, S*4*H1)
        whh1=whh1_t.astype(jnp.bfloat16),                   # (H1, 4*H1)
        w2=w2.astype(jnp.bfloat16),                         # (H1+H2, 4*H2)
        b2=b2.reshape(1, 4 * H2).astype(jnp.float32),
        wfin=params["w_fin"].reshape(S, H2).astype(jnp.float32),   # (S, H2)
        bfin=params["b_fin"].reshape(1, 1).astype(jnp.float32),
    )


@jax.jit
def mv_lstm_supervised_forward(x, time, prepped):
    """x: (B, S, F) f32, time: (B, 1) f32, prepped from prepare_params -> (B, 1) f32."""
    B, S, F = x.shape
    assert S == SEQ_LEN and F == N_FEATURES
    SF = S * F

    xf = x.reshape(B, SF).astype(jnp.float32)
    t = time.reshape(B, 1).astype(jnp.float32)

    # Generation-aware batch tiling:
    #  * B >= 256: bm=128 so the grid has >= 2 steps and v7x's two TensorCores
    #    both get work ("parallel" axis); single-TC v5e/v6e just see a short
    #    serial grid (per-step overhead ~0.35 us, negligible here).
    #  * B < 256: one block; block shape == full array so no (8,128) issue.
    #  * Non-divisible B: pad to a cdiv grid (bounded per-block VMEM) and slice
    #    the output — no more single-block bm=B fallback.
    bm = 128 if B >= 256 else B
    n_blocks = pl.cdiv(B, bm)
    Bp = n_blocks * bm
    if Bp != B:
        xf = jnp.pad(xf, ((0, Bp - B), (0, 0)))
        t = jnp.pad(t, ((0, Bp - B), (0, 0)))

    grid = (n_blocks,)
    batch_map = lambda i: (i, 0)
    const_map = lambda i: (0, 0)

    w_order = ("wcx", "wct", "bc", "wih1_blk", "whh1", "w2", "b2", "wfin", "bfin")
    weights = [prepped[k] for k in w_order]

    in_specs = (
        [pl.BlockSpec((bm, SF), batch_map), pl.BlockSpec((bm, 1), batch_map)]
        + [pl.BlockSpec(w.shape, const_map) for w in weights]
    )
    out_spec = pl.BlockSpec((bm, 1), batch_map)

    out = pl.pallas_call(
        mv_lstm_supervised_kernel,
        out_shape=jax.ShapeDtypeStruct((Bp, 1), jnp.float32),
        grid=grid,
        in_specs=in_specs,
        out_specs=out_spec,
        compiler_params=pltpu.CompilerParams(dimension_semantics=("parallel",)),
    )(xf, t, *weights)
    return out[:B]


def _reference_forward(x, time, params):
    """Pure-JAX f32 reference mirroring the PyTorch forward (for validation)."""
    B, S, F = x.shape
    SF = S * F
    xf = jnp.concatenate([x.reshape(B, SF), time.reshape(B, 1)], axis=1)
    xf = jnp.maximum(xf @ params["w_combine"].T + params["b_combine"], 0.0)
    xs = xf.reshape(B, S, F)

    def cell(x_t, h, c, w_ih, w_hh, b):
        g = x_t @ w_ih.T + h @ w_hh.T + (b if b is not None else 0.0)
        H = h.shape[1]
        i = jax.nn.sigmoid(g[:, :H]); f = jax.nn.sigmoid(g[:, H:2 * H])
        gg = jnp.tanh(g[:, 2 * H:3 * H]); o = jax.nn.sigmoid(g[:, 3 * H:])
        c = f * c + i * gg
        return o * jnp.tanh(c), c

    h1 = jnp.zeros((B, N_HIDDEN)); c1 = jnp.zeros((B, N_HIDDEN))
    h2 = jnp.zeros((B, N_HIDDEN2)); c2 = jnp.zeros((B, N_HIDDEN2))
    outs = []
    for s in range(S):
        h1, c1 = cell(xs[:, s, :], h1, c1, params["w_ih1"], params["w_hh1"], None)
        h2, c2 = cell(h1, h2, c2, params["w_ih2"], params["w_hh2"],
                      params["b_ih2"] + params["b_hh2"])
        outs.append(h2)
    flat = jnp.concatenate(outs, axis=1)
    return flat @ params["w_fin"].T + params["b_fin"]


if __name__ == "__main__":
    key = jax.random.PRNGKey(0)
    k_x, k_t, k_p = jax.random.split(key, 3)

    B = 4
    x = jax.random.normal(k_x, (B, SEQ_LEN, N_FEATURES), jnp.float32)
    time = jax.random.normal(k_t, (B, 1), jnp.float32)

    params = make_params(k_p)
    prepped = prepare_params(params)   # one-time prep, outside the jitted call path

    out = mv_lstm_supervised_forward(x, time, prepped)
    out = jax.block_until_ready(out)

    ref = _reference_forward(x, time, params)
    assert out.shape == (B, 1)
    # bf16 matmul operands (f32 accumulation) => loosened tolerance vs f32 reference.
    assert jnp.allclose(out, ref, atol=3e-2, rtol=3e-2), (
        out, ref, jnp.abs(out - ref).max())

    print("KERNEL_OK")
</pallas_src>

<mosaic_0001>
module attributes {stable_mosaic.version = 11 : i64} {
  func.func @mv_lstm_supervised_kernel(%arg0: i32, %arg1: memref<4x32xf32, #tpu.memory_space<vmem>>, %arg2: memref<4x1xf32, #tpu.memory_space<vmem>>, %arg3: memref<32x32xbf16, #tpu.memory_space<vmem>>, %arg4: memref<1x32xf32, #tpu.memory_space<vmem>>, %arg5: memref<1x32xf32, #tpu.memory_space<vmem>>, %arg6: memref<32x2048xbf16, #tpu.memory_space<vmem>>, %arg7: memref<64x256xbf16, #tpu.memory_space<vmem>>, %arg8: memref<96x128xbf16, #tpu.memory_space<vmem>>, %arg9: memref<1x128xf32, #tpu.memory_space<vmem>>, %arg10: memref<8x32xf32, #tpu.memory_space<vmem>>, %arg11: memref<1x1xf32, #tpu.memory_space<vmem>>, %arg12: memref<4x1xf32, #tpu.memory_space<vmem>>) attributes {dimension_semantics = [#tpu.dimension_semantics<parallel>], iteration_bounds = array<i64: 1>, scalar_prefetch = 0 : i64, scratch_operands = 0 : i64, tpu.core_type = #tpu.core_type<tc>, window_params = [{transform_indices = @transform_0, window_bounds = array<i64: 4, 32>}, {transform_indices = @transform_1, window_bounds = array<i64: 4, 1>}, {pipeline_mode = #tpu.pipeline_mode<synchronous>, transform_indices = @transform_2, window_bounds = array<i64: 32, 32>}, {pipeline_mode = #tpu.pipeline_mode<synchronous>, transform_indices = @transform_3, window_bounds = array<i64: 1, 32>}, {pipeline_mode = #tpu.pipeline_mode<synchronous>, transform_indices = @transform_4, window_bounds = array<i64: 1, 32>}, {pipeline_mode = #tpu.pipeline_mode<synchronous>, transform_indices = @transform_5, window_bounds = array<i64: 32, 2048>}, {pipeline_mode = #tpu.pipeline_mode<synchronous>, transform_indices = @transform_6, window_bounds = array<i64: 64, 256>}, {pipeline_mode = #tpu.pipeline_mode<synchronous>, transform_indices = @transform_7, window_bounds = array<i64: 96, 128>}, {pipeline_mode = #tpu.pipeline_mode<synchronous>, transform_indices = @transform_8, window_bounds = array<i64: 1, 128>}, {pipeline_mode = #tpu.pipeline_mode<synchronous>, transform_indices = @transform_9, window_bounds = array<i64: 8, 32>}, {pipeline_mode = #tpu.pipeline_mode<synchronous>, transform_indices = @transform_10, window_bounds = array<i64: 1, 1>}, {transform_indices = @transform_11, window_bounds = array<i64: 4, 1>}]} {
    %c0 = arith.constant 0 : index
    %c0_0 = arith.constant 0 : index
    %0 = vector.load %arg1[%c0, %c0_0] : memref<4x32xf32, #tpu.memory_space<vmem>>, vector<4x32xf32>
    %c0_1 = arith.constant 0 : index
    %c0_2 = arith.constant 0 : index
    %1 = vector.load %arg2[%c0_1, %c0_2] : memref<4x1xf32, #tpu.memory_space<vmem>>, vector<4x1xf32>
    %2 = arith.truncf %0 : vector<4x32xf32> to vector<4x32xbf16>
    %c0_3 = arith.constant 0 : index
    %c0_4 = arith.constant 0 : index
    %3 = vector.load %arg3[%c0_3, %c0_4] : memref<32x32xbf16, #tpu.memory_space<vmem>>, vector<32x32xbf16>
    %cst = arith.constant dense<0.000000e+00> : vector<4x32xf32>
    %4 = tpu.matmul %2, %3, %cst {dimension_numbers = #tpu.dot_dimension_numbers<[1], [0], [0], [1], [0, 0, 1, 1], [], []>} : vector<4x32xbf16>, vector<32x32xbf16>, vector<4x32xf32> -> vector<4x32xf32>
    %c0_5 = arith.constant 0 : index
    %c0_6 = arith.constant 0 : index
    %5 = vector.load %arg4[%c0_5, %c0_6] : memref<1x32xf32, #tpu.memory_space<vmem>>, vector<1x32xf32>
    %6 = vector.broadcast %1 : vector<4x1xf32> to vector<4x32xf32>
    %7 = vector.broadcast %5 : vector<1x32xf32> to vector<4x32xf32>
    %8 = arith.mulf %6, %7 : vector<4x32xf32>
    %9 = arith.addf %4, %8 : vector<4x32xf32>
    %c0_7 = arith.constant 0 : index
    %c0_8 = arith.constant 0 : index
    %10 = vector.load %arg5[%c0_7, %c0_8] : memref<1x32xf32, #tpu.memory_space<vmem>>, vector<1x32xf32>
    %11 = vector.broadcast %10 : vector<1x32xf32> to vector<4x32xf32>
    %12 = arith.addf %9, %11 : vector<4x32xf32>
    %cst_9 = arith.constant 0.000000e+00 : f32
    %13 = vector.broadcast %cst_9 : f32 to vector<4x32xf32>
    %14 = arith.maximumf %12, %13 : vector<4x32xf32>
    %15 = arith.truncf %14 : vector<4x32xf32> to vector<4x32xbf16>
    %c0_10 = arith.constant 0 : index
    %c0_11 = arith.constant 0 : index
    %16 = vector.load %arg6[%c0_10, %c0_11] : memref<32x2048xbf16, #tpu.memory_space<vmem>>, vector<32x2048xbf16>
    %cst_12 = arith.constant dense<0.000000e+00> : vector<4x2048xf32>
    %17 = tpu.matmul %15, %16, %cst_12 {dimension_numbers = #tpu.dot_dimension_numbers<[1], [0], [0], [1], [0, 0, 1, 1], [], []>} : vector<4x32xbf16>, vector<32x2048xbf16>, vector<4x2048xf32> -> vector<4x2048xf32>
    %c0_13 = arith.constant 0 : index
    %c0_14 = arith.constant 0 : index
    %18 = vector.load %arg7[%c0_13, %c0_14] : memref<64x256xbf16, #tpu.memory_space<vmem>>, vector<64x256xbf16>
    %c0_15 = arith.constant 0 : index
    %c0_16 = arith.constant 0 : index
    %19 = vector.load %arg8[%c0_15, %c0_16] : memref<96x128xbf16, #tpu.memory_space<vmem>>, vector<96x128xbf16>
    %c0_17 = arith.constant 0 : index
    %c0_18 = arith.constant 0 : index
    %20 = vector.load %arg9[%c0_17, %c0_18] : memref<1x128xf32, #tpu.memory_space<vmem>>, vector<1x128xf32>
    %21 = vector.shape_cast %20 : vector<1x128xf32> to vector<1x128xf32>
    %22 = vector.broadcast %21 : vector<1x128xf32> to vector<4x128xf32>
    %c0_19 = arith.constant 0 : index
    %c0_20 = arith.constant 0 : index
    %23 = vector.load %arg10[%c0_19, %c0_20] : memref<8x32xf32, #tpu.memory_space<vmem>>, vector<8x32xf32>
    %cst_21 = arith.constant 0.000000e+00 : f32
    %24 = vector.broadcast %cst_21 : f32 to vector<4x64xf32>
    %cst_22 = arith.constant 0.000000e+00 : f32
    %25 = vector.broadcast %cst_22 : f32 to vector<4x64xf32>
    %cst_23 = arith.constant 0.000000e+00 : f32
    %26 = vector.broadcast %cst_23 : f32 to vector<4x32xf32>
    %cst_24 = arith.constant 0.000000e+00 : f32
    %27 = vector.broadcast %cst_24 : f32 to vector<4x32xf32>
    %cst_25 = arith.constant 0.000000e+00 : f32
    %28 = vector.broadcast %cst_25 : f32 to vector<4x32xf32>
    %29 = vector.extract_strided_slice %17 {offsets = [0, 0], sizes = [4, 256], strides = [1, 1]} : vector<4x2048xf32> to vector<4x256xf32>
    %30 = arith.truncf %24 : vector<4x64xf32> to vector<4x64xbf16>
    %cst_26 = arith.constant dense<0.000000e+00> : vector<4x256xf32>
    %31 = tpu.matmul %30, %18, %cst_26 {dimension_numbers = #tpu.dot_dimension_numbers<[1], [0], [0], [1], [0, 0, 1, 1], [], []>} : vector<4x64xbf16>, vector<64x256xbf16>, vector<4x256xf32> -> vector<4x256xf32>
    %32 = arith.addf %29, %31 : vector<4x256xf32>
    %cst_27 = arith.constant 5.000000e-01 : f32
    %33 = vector.broadcast %cst_27 : f32 to vector<4x256xf32>
    %34 = arith.mulf %33, %32 : vector<4x256xf32>
    %35 = math.tanh %34 : vector<4x256xf32>
    %36 = vector.extract_strided_slice %35 {offsets = [0, 0], sizes = [4, 64], strides = [1, 1]} : vector<4x256xf32> to vector<4x64xf32>
    %cst_28 = arith.constant 5.000000e-01 : f32
    %37 = vector.broadcast %cst_28 : f32 to vector<4x64xf32>
    %38 = arith.mulf %37, %36 : vector<4x64xf32>
    %cst_29 = arith.constant 5.000000e-01 : f32
    %39 = vector.broadcast %cst_29 : f32 to vector<4x64xf32>
    %40 = arith.addf %38, %39 : vector<4x64xf32>
    %41 = vector.extract_strided_slice %35 {offsets = [0, 64], sizes = [4, 64], strides = [1, 1]} : vector<4x256xf32> to vector<4x64xf32>
    %cst_30 = arith.constant 5.000000e-01 : f32
    %42 = vector.broadcast %cst_30 : f32 to vector<4x64xf32>
    %43 = arith.mulf %42, %41 : vector<4x64xf32>
    %cst_31 = arith.constant 5.000000e-01 : f32
    %44 = vector.broadcast %cst_31 : f32 to vector<4x64xf32>
    %45 = arith.addf %43, %44 : vector<4x64xf32>
    %46 = vector.extract_strided_slice %35 {offsets = [0, 128], sizes = [4, 64], strides = [1, 1]} : vector<4x256xf32> to vector<4x64xf32>
    %47 = vector.extract_strided_slice %35 {offsets = [0, 192], sizes = [4, 64], strides = [1, 1]} : vector<4x256xf32> to vector<4x64xf32>
    %cst_32 = arith.constant 5.000000e-01 : f32
    %48 = vector.broadcast %cst_32 : f32 to vector<4x64xf32>
    %49 = arith.mulf %48, %47 : vector<4x64xf32>
    %cst_33 = arith.constant 5.000000e-01 : f32
    %50 = vector.broadcast %cst_33 : f32 to vector<4x64xf32>
    %51 = arith.addf %49, %50 : vector<4x64xf32>
    %52 = arith.mulf %45, %25 : vector<4x64xf32>
    %53 = arith.mulf %40, %46 : vector<4x64xf32>
    %54 = arith.addf %52, %53 : vector<4x64xf32>
    %55 = math.tanh %54 : vector<4x64xf32>
    %56 = arith.mulf %51, %55 : vector<4x64xf32>
    %57 = tpu.concatenate %56, %26 in 1 : vector<4x64xf32>, vector<4x32xf32> -> vector<4x96xf32>
    %58 = arith.truncf %57 : vector<4x96xf32> to vector<4x96xbf16>
    %cst_34 = arith.constant dense<0.000000e+00> : vector<4x128xf32>
    %59 = tpu.matmul %58, %19, %cst_34 {dimension_numbers = #tpu.dot_dimension_numbers<[1], [0], [0], [1], [0, 0, 1, 1], [], []>} : vector<4x96xbf16>, vector<96x128xbf16>, vector<4x128xf32> -> vector<4x128xf32>
    %60 = arith.addf %59, %22 : vector<4x128xf32>
    %cst_35 = arith.constant 5.000000e-01 : f32
    %61 = vector.broadcast %cst_35 : f32 to vector<4x128xf32>
    %62 = arith.mulf %61, %60 : vector<4x128xf32>
    %63 = math.tanh %62 : vector<4x128xf32>
    %64 = vector.extract_strided_slice %63 {offsets = [0, 0], sizes = [4, 32], strides = [1, 1]} : vector<4x128xf32> to vector<4x32xf32>
    %cst_36 = arith.constant 5.000000e-01 : f32
    %65 = vector.broadcast %cst_36 : f32 to vector<4x32xf32>
    %66 = arith.mulf %65, %64 : vector<4x32xf32>
    %cst_37 = arith.constant 5.000000e-01 : f32
    %67 = vector.broadcast %cst_37 : f32 to vector<4x32xf32>
    %68 = arith.addf %66, %67 : vector<4x32xf32>
    %69 = vector.extract_strided_slice %63 {offsets = [0, 32], sizes = [4, 32], strides = [1, 1]} : vector<4x128xf32> to vector<4x32xf32>
    %cst_38 = arith.constant 5.000000e-01 : f32
    %70 = vector.broadcast %cst_38 : f32 to vector<4x32xf32>
    %71 = arith.mulf %70, %69 : vector<4x32xf32>
    %cst_39 = arith.constant 5.000000e-01 : f32
    %72 = vector.broadcast %cst_39 : f32 to vector<4x32xf32>
    %73 = arith.addf %71, %72 : vector<4x32xf32>
    %74 = vector.extract_strided_slice %63 {offsets = [0, 64], sizes = [4, 32], strides = [1, 1]} : vector<4x128xf32> to vector<4x32xf32>
    %75 = vector.extract_strided_slice %63 {offsets = [0, 96], sizes = [4, 32], strides = [1, 1]} : vector<4x128xf32> to vector<4x32xf32>
    %cst_40 = arith.constant 5.000000e-01 : f32
    %76 = vector.broadcast %cst_40 : f32 to vector<4x32xf32>
    %77 = arith.mulf %76, %75 : vector<4x32xf32>
    %cst_41 = arith.constant 5.000000e-01 : f32
    %78 = vector.broadcast %cst_41 : f32 to vector<4x32xf32>
    %79 = arith.addf %77, %78 : vector<4x32xf32>
    %80 = arith.mulf %73, %27 : vector<4x32xf32>
    %81 = arith.mulf %68, %74 : vector<4x32xf32>
    %82 = arith.addf %80, %81 : vector<4x32xf32>
    %83 = math.tanh %82 : vector<4x32xf32>
    %84 = arith.mulf %79, %83 : vector<4x32xf32>
    %85 = vector.extract_strided_slice %23 {offsets = [0, 0], sizes = [1, 32], strides = [1, 1]} : vector<8x32xf32> to vector<1x32xf32>
    %86 = vector.broadcast %85 : vector<1x32xf32> to vector<4x32xf32>
    %87 = arith.mulf %84, %86 : vector<4x32xf32>
    %88 = arith.addf %28, %87 : vector<4x32xf32>
    %89 = vector.extract_strided_slice %17 {offsets = [0, 256], sizes = [4, 256], strides = [1, 1]} : vector<4x2048xf32> to vector<4x256xf32>
    %90 = arith.truncf %56 : vector<4x64xf32> to vector<4x64xbf16>
    %cst_42 = arith.constant dense<0.000000e+00> : vector<4x256xf32>
    %91 = tpu.matmul %90, %18, %cst_42 {dimension_numbers = #tpu.dot_dimension_numbers<[1], [0], [0], [1], [0, 0, 1, 1], [], []>} : vector<4x64xbf16>, vector<64x256xbf16>, vector<4x256xf32> -> vector<4x256xf32>
    %92 = arith.addf %89, %91 : vector<4x256xf32>
    %cst_43 = arith.constant 5.000000e-01 : f32
    %93 = vector.broadcast %cst_43 : f32 to vector<4x256xf32>
    %94 = arith.mulf %93, %92 : vector<4x256xf32>
    %95 = math.tanh %94 : vector<4x256xf32>
    %96 = vector.extract_strided_slice %95 {offsets = [0, 0], sizes = [4, 64], strides = [1, 1]} : vector<4x256xf32> to vector<4x64xf32>
    %cst_44 = arith.constant 5.000000e-01 : f32
    %97 = vector.broadcast %cst_44 : f32 to vector<4x64xf32>
    %98 = arith.mulf %97, %96 : vector<4x64xf32>
    %cst_45 = arith.constant 5.000000e-01 : f32
    %99 = vector.broadcast %cst_45 : f32 to vector<4x64xf32>
    %100 = arith.addf %98, %99 : vector<4x64xf32>
    %101 = vector.extract_strided_slice %95 {offsets = [0, 64], sizes = [4, 64], strides = [1, 1]} : vector<4x256xf32> to vector<4x64xf32>
    %cst_46 = arith.constant 5.000000e-01 : f32
    %102 = vector.broadcast %cst_46 : f32 to vector<4x64xf32>
    %103 = arith.mulf %102, %101 : vector<4x64xf32>
    %cst_47 = arith.constant 5.000000e-01 : f32
    %104 = vector.broadcast %cst_47 : f32 to vector<4x64xf32>
    %105 = arith.addf %103, %104 : vector<4x64xf32>
    %106 = vector.extract_strided_slice %95 {offsets = [0, 128], sizes = [4, 64], strides = [1, 1]} : vector<4x256xf32> to vector<4x64xf32>
    %107 = vector.extract_strided_slice %95 {offsets = [0, 192], sizes = [4, 64], strides = [1, 1]} : vector<4x256xf32> to vector<4x64xf32>
    %cst_48 = arith.constant 5.000000e-01 : f32
    %108 = vector.broadcast %cst_48 : f32 to vector<4x64xf32>
    %109 = arith.mulf %108, %107 : vector<4x64xf32>
    %cst_49 = arith.constant 5.000000e-01 : f32
    %110 = vector.broadcast %cst_49 : f32 to vector<4x64xf32>
    %111 = arith.addf %109, %110 : vector<4x64xf32>
    %112 = arith.mulf %105, %54 : vector<4x64xf32>
    %113 = arith.mulf %100, %106 : vector<4x64xf32>
    %114 = arith.addf %112, %113 : vector<4x64xf32>
    %115 = math.tanh %114 : vector<4x64xf32>
    %116 = arith.mulf %111, %115 : vector<4x64xf32>
    %117 = tpu.concatenate %116, %84 in 1 : vector<4x64xf32>, vector<4x32xf32> -> vector<4x96xf32>
    %118 = arith.truncf %117 : vector<4x96xf32> to vector<4x96xbf16>
    %cst_50 = arith.constant dense<0.000000e+00> : vector<4x128xf32>
    %119 = tpu.matmul %118, %19, %cst_50 {dimension_numbers = #tpu.dot_dimension_numbers<[1], [0], [0], [1], [0, 0, 1, 1], [], []>} : vector<4x96xbf16>, vector<96x128xbf16>, vector<4x128xf32> -> vector<4x128xf32>
    %120 = arith.addf %119, %22 : vector<4x128xf32>
    %cst_51 = arith.constant 5.000000e-01 : f32
    %121 = vector.broadcast %cst_51 : f32 to vector<4x128xf32>
    %122 = arith.mulf %121, %120 : vector<4x128xf32>
    %123 = math.tanh %122 : vector<4x128xf32>
    %124 = vector.extract_strided_slice %123 {offsets = [0, 0], sizes = [4, 32], strides = [1, 1]} : vector<4x128xf32> to vector<4x32xf32>
    %cst_52 = arith.constant 5.000000e-01 : f32
    %125 = vector.broadcast %cst_52 : f32 to vector<4x32xf32>
    %126 = arith.mulf %125, %124 : vector<4x32xf32>
    %cst_53 = arith.constant 5.000000e-01 : f32
    %127 = vector.broadcast %cst_53 : f32 to vector<4x32xf32>
    %128 = arith.addf %126, %127 : vector<4x32xf32>
    %129 = vector.extract_strided_slice %123 {offsets = [0, 32], sizes = [4, 32], strides = [1, 1]} : vector<4x128xf32> to vector<4x32xf32>
    %cst_54 = arith.constant 5.000000e-01 : f32
    %130 = vector.broadcast %cst_54 : f32 to vector<4x32xf32>
    %131 = arith.mulf %130, %129 : vector<4x32xf32>
    %cst_55 = arith.constant 5.000000e-01 : f32
    %132 = vector.broadcast %cst_55 : f32 to vector<4x32xf32>
    %133 = arith.addf %131, %132 : vector<4x32xf32>
    %134 = vector.extract_strided_slice %123 {offsets = [0, 64], sizes = [4, 32], strides = [1, 1]} : vector<4x128xf32> to vector<4x32xf32>
    %135 = vector.extract_strided_slice %123 {offsets = [0, 96], sizes = [4, 32], strides = [1, 1]} : vector<4x128xf32> to vector<4x32xf32>
    %cst_56 = arith.constant 5.000000e-01 : f32
    %136 = vector.broadcast %cst_56 : f32 to vector<4x32xf32>
    %137 = arith.mulf %136, %135 : vector<4x32xf32>
    %cst_57 = arith.constant 5.000000e-01 : f32
    %138 = vector.broadcast %cst_57 : f32 to vector<4x32xf32>
    %139 = arith.addf %137, %138 : vector<4x32xf32>
    %140 = arith.mulf %133, %82 : vector<4x32xf32>
    %141 = arith.mulf %128, %134 : vector<4x32xf32>
    %142 = arith.addf %140, %141 : vector<4x32xf32>
    %143 = math.tanh %142 : vector<4x32xf32>
    %144 = arith.mulf %139, %143 : vector<4x32xf32>
    %145 = vector.extract_strided_slice %23 {offsets = [1, 0], sizes = [1, 32], strides = [1, 1]} : vector<8x32xf32> to vector<1x32xf32>
    %146 = vector.broadcast %145 : vector<1x32xf32> to vector<4x32xf32>
    %147 = arith.mulf %144, %146 : vector<4x32xf32>
    %148 = arith.addf %88, %147 : vector<4x32xf32>
    %149 = vector.extract_strided_slice %17 {offsets = [0, 512], sizes = [4, 256], strides = [1, 1]} : vector<4x2048xf32> to vector<4x256xf32>
    %150 = arith.truncf %116 : vector<4x64xf32> to vector<4x64xbf16>
    %cst_58 = arith.constant dense<0.000000e+00> : vector<4x256xf32>
    %151 = tpu.matmul %150, %18, %cst_58 {dimension_numbers = #tpu.dot_dimension_numbers<[1], [0], [0], [1], [0, 0, 1, 1], [], []>} : vector<4x64xbf16>, vector<64x256xbf16>, vector<4x256xf32> -> vector<4x256xf32>
    %152 = arith.addf %149, %151 : vector<4x256xf32>
    %cst_59 = arith.constant 5.000000e-01 : f32
    %153 = vector.broadcast %cst_59 : f32 to vector<4x256xf32>
    %154 = arith.mulf %153, %152 : vector<4x256xf32>
    %155 = math.tanh %154 : vector<4x256xf32>
    %156 = vector.extract_strided_slice %155 {offsets = [0, 0], sizes = [4, 64], strides = [1, 1]} : vector<4x256xf32> to vector<4x64xf32>
    %cst_60 = arith.constant 5.000000e-01 : f32
    %157 = vector.broadcast %cst_60 : f32 to vector<4x64xf32>
    %158 = arith.mulf %157, %156 : vector<4x64xf32>
    %cst_61 = arith.constant 5.000000e-01 : f32
    %159 = vector.broadcast %cst_61 : f32 to vector<4x64xf32>
    %160 = arith.addf %158, %159 : vector<4x64xf32>
    %161 = vector.extract_strided_slice %155 {offsets = [0, 64], sizes = [4, 64], strides = [1, 1]} : vector<4x256xf32> to vector<4x64xf32>
    %cst_62 = arith.constant 5.000000e-01 : f32
    %162 = vector.broadcast %cst_62 : f32 to vector<4x64xf32>
    %163 = arith.mulf %162, %161 : vector<4x64xf32>
    %cst_63 = arith.constant 5.000000e-01 : f32
    %164 = vector.broadcast %cst_63 : f32 to vector<4x64xf32>
    %165 = arith.addf %163, %164 : vector<4x64xf32>
    %166 = vector.extract_strided_slice %155 {offsets = [0, 128], sizes = [4, 64], strides = [1, 1]} : vector<4x256xf32> to vector<4x64xf32>
    %167 = vector.extract_strided_slice %155 {offsets = [0, 192], sizes = [4, 64], strides = [1, 1]} : vector<4x256xf32> to vector<4x64xf32>
    %cst_64 = arith.constant 5.000000e-01 : f32
    %168 = vector.broadcast %cst_64 : f32 to vector<4x64xf32>
    %169 = arith.mulf %168, %167 : vector<4x64xf32>
    %cst_65 = arith.constant 5.000000e-01 : f32
    %170 = vector.broadcast %cst_65 : f32 to vector<4x64xf32>
    %171 = arith.addf %169, %170 : vector<4x64xf32>
    %172 = arith.mulf %165, %114 : vector<4x64xf32>
    %173 = arith.mulf %160, %166 : vector<4x64xf32>
    %174 = arith.addf %172, %173 : vector<4x64xf32>
    %175 = math.tanh %174 : vector<4x64xf32>
    %176 = arith.mulf %171, %175 : vector<4x64xf32>
    %177 = tpu.concatenate %176, %144 in 1 : vector<4x64xf32>, vector<4x32xf32> -> vector<4x96xf32>
    %178 = arith.truncf %177 : vector<4x96xf32> to vector<4x96xbf16>
    %cst_66 = arith.constant dense<0.000000e+00> : vector<4x128xf32>
    %179 = tpu.matmul %178, %19, %cst_66 {dimension_numbers = #tpu.dot_dimension_numbers<[1], [0], [0], [1], [0, 0, 1, 1], [], []>} : vector<4x96xbf16>, vector<96x128xbf16>, vector<4x128xf32> -> vector<4x128xf32>
    %180 = arith.addf %179, %22 : vector<4x128xf32>
    %cst_67 = arith.constant 5.000000e-01 : f32
    %181 = vector.broadcast %cst_67 : f32 to vector<4x128xf32>
    %182 = arith.mulf %181, %180 : vector<4x128xf32>
    %183 = math.tanh %182 : vector<4x128xf32>
    %184 = vector.extract_strided_slice %183 {offsets = [0, 0], sizes = [4, 32], strides = [1, 1]} : vector<4x128xf32> to vector<4x32xf32>
    %cst_68 = arith.constant 5.000000e-01 : f32
    %185 = vector.broadcast %cst_68 : f32 to vector<4x32xf32>
    %186 = arith.mulf %185, %184 : vector<4x32xf32>
    %cst_69 = arith.constant 5.000000e-01 : f32
    %187 = vector.broadcast %cst_69 : f32 to vector<4x32xf32>
    %188 = arith.addf %186, %187 : vector<4x32xf32>
    %189 = vector.extract_strided_slice %183 {offsets = [0, 32], sizes = [4, 32], strides = [1, 1]} : vector<4x128xf32> to vector<4x32xf32>
    %cst_70 = arith.constant 5.000000e-01 : f32
    %190 = vector.broadcast %cst_70 : f32 to vector<4x32xf32>
    %191 = arith.mulf %190, %189 : vector<4x32xf32>
    %cst_71 = arith.constant 5.000000e-01 : f32
    %192 = vector.broadcast %cst_71 : f32 to vector<4x32xf32>
    %193 = arith.addf %191, %192 : vector<4x32xf32>
    %194 = vector.extract_strided_slice %183 {offsets = [0, 64], sizes = [4, 32], strides = [1, 1]} : vector<4x128xf32> to vector<4x32xf32>
    %195 = vector.extract_strided_slice %183 {offsets = [0, 96], sizes = [4, 32], strides = [1, 1]} : vector<4x128xf32> to vector<4x32xf32>
    %cst_72 = arith.constant 5.000000e-01 : f32
    %196 = vector.broadcast %cst_72 : f32 to vector<4x32xf32>
    %197 = arith.mulf %196, %195 : vector<4x32xf32>
    %cst_73 = arith.constant 5.000000e-01 : f32
    %198 = vector.broadcast %cst_73 : f32 to vector<4x32xf32>
    %199 = arith.addf %197, %198 : vector<4x32xf32>
    %200 = arith.mulf %193, %142 : vector<4x32xf32>
    %201 = arith.mulf %188, %194 : vector<4x32xf32>
    %202 = arith.addf %200, %201 : vector<4x32xf32>
    %203 = math.tanh %202 : vector<4x32xf32>
    %204 = arith.mulf %199, %203 : vector<4x32xf32>
    %205 = vector.extract_strided_slice %23 {offsets = [2, 0], sizes = [1, 32], strides = [1, 1]} : vector<8x32xf32> to vector<1x32xf32>
    %206 = vector.broadcast %205 : vector<1x32xf32> to vector<4x32xf32>
    %207 = arith.mulf %204, %206 : vector<4x32xf32>
    %208 = arith.addf %148, %207 : vector<4x32xf32>
    %209 = vector.extract_strided_slice %17 {offsets = [0, 768], sizes = [4, 256], strides = [1, 1]} : vector<4x2048xf32> to vector<4x256xf32>
    %210 = arith.truncf %176 : vector<4x64xf32> to vector<4x64xbf16>
    %cst_74 = arith.constant dense<0.000000e+00> : vector<4x256xf32>
    %211 = tpu.matmul %210, %18, %cst_74 {dimension_numbers = #tpu.dot_dimension_numbers<[1], [0], [0], [1], [0, 0, 1, 1], [], []>} : vector<4x64xbf16>, vector<64x256xbf16>, vector<4x256xf32> -> vector<4x256xf32>
    %212 = arith.addf %209, %211 : vector<4x256xf32>
    %cst_75 = arith.constant 5.000000e-01 : f32
    %213 = vector.broadcast %cst_75 : f32 to vector<4x256xf32>
    %214 = arith.mulf %213, %212 : vector<4x256xf32>
    %215 = math.tanh %214 : vector<4x256xf32>
    %216 = vector.extract_strided_slice %215 {offsets = [0, 0], sizes = [4, 64], strides = [1, 1]} : vector<4x256xf32> to vector<4x64xf32>
    %cst_76 = arith.constant 5.000000e-01 : f32
    %217 = vector.broadcast %cst_76 : f32 to vector<4x64xf32>
    %218 = arith.mulf %217, %216 : vector<4x64xf32>
    %cst_77 = arith.constant 5.000000e-01 : f32
    %219 = vector.broadcast %cst_77 : f32 to vector<4x64xf32>
    %220 = arith.addf %218, %219 : vector<4x64xf32>
    %221 = vector.extract_strided_slice %215 {offsets = [0, 64], sizes = [4, 64], strides = [1, 1]} : vector<4x256xf32> to vector<4x64xf32>
    %cst_78 = arith.constant 5.000000e-01 : f32
    %222 = vector.broadcast %cst_78 : f32 to vector<4x64xf32>
    %223 = arith.mulf %222, %221 : vector<4x64xf32>
    %cst_79 = arith.constant 5.000000e-01 : f32
    %224 = vector.broadcast %cst_79 : f32 to vector<4x64xf32>
    %225 = arith.addf %223, %224 : vector<4x64xf32>
    %226 = vector.extract_strided_slice %215 {offsets = [0, 128], sizes = [4, 64], strides = [1, 1]} : vector<4x256xf32> to vector<4x64xf32>
    %227 = vector.extract_strided_slice %215 {offsets = [0, 192], sizes = [4, 64], strides = [1, 1]} : vector<4x256xf32> to vector<4x64xf32>
    %cst_80 = arith.constant 5.000000e-01 : f32
    %228 = vector.broadcast %cst_80 : f32 to vector<4x64xf32>
    %229 = arith.mulf %228, %227 : vector<4x64xf32>
    %cst_81 = arith.constant 5.000000e-01 : f32
    %230 = vector.broadcast %cst_81 : f32 to vector<4x64xf32>
    %231 = arith.addf %229, %230 : vector<4x64xf32>
    %232 = arith.mulf %225, %174 : vector<4x64xf32>
    %233 = arith.mulf %220, %226 : vector<4x64xf32>
    %234 = arith.addf %232, %233 : vector<4x64xf32>
    %235 = math.tanh %234 : vector<4x64xf32>
    %236 = arith.mulf %231, %235 : vector<4x64xf32>
    %237 = tpu.concatenate %236, %204 in 1 : vector<4x64xf32>, vector<4x32xf32> -> vector<4x96xf32>
    %238 = arith.truncf %237 : vector<4x96xf32> to vector<4x96xbf16>
    %cst_82 = arith.constant dense<0.000000e+00> : vector<4x128xf32>
    %239 = tpu.matmul %238, %19, %cst_82 {dimension_numbers = #tpu.dot_dimension_numbers<[1], [0], [0], [1], [0, 0, 1, 1], [], []>} : vector<4x96xbf16>, vector<96x128xbf16>, vector<4x128xf32> -> vector<4x128xf32>
    %240 = arith.addf %239, %22 : vector<4x128xf32>
    %cst_83 = arith.constant 5.000000e-01 : f32
    %241 = vector.broadcast %cst_83 : f32 to vector<4x128xf32>
    %242 = arith.mulf %241, %240 : vector<4x128xf32>
    %243 = math.tanh %242 : vector<4x128xf32>
    %244 = vector.extract_strided_slice %243 {offsets = [0, 0], sizes = [4, 32], strides = [1, 1]} : vector<4x128xf32> to vector<4x32xf32>
    %cst_84 = arith.constant 5.000000e-01 : f32
    %245 = vector.broadcast %cst_84 : f32 to vector<4x32xf32>
    %246 = arith.mulf %245, %244 : vector<4x32xf32>
    %cst_85 = arith.constant 5.000000e-01 : f32
    %247 = vector.broadcast %cst_85 : f32 to vector<4x32xf32>
    %248 = arith.addf %246, %247 : vector<4x32xf32>
    %249 = vector.extract_strided_slice %243 {offsets = [0, 32], sizes = [4, 32], strides = [1, 1]} : vector<4x128xf32> to vector<4x32xf32>
    %cst_86 = arith.constant 5.000000e-01 : f32
    %250 = vector.broadcast %cst_86 : f32 to vector<4x32xf32>
    %251 = arith.mulf %250, %249 : vector<4x32xf32>
    %cst_87 = arith.constant 5.000000e-01 : f32
    %252 = vector.broadcast %cst_87 : f32 to vector<4x32xf32>
    %253 = arith.addf %251, %252 : vector<4x32xf32>
    %254 = vector.extract_strided_slice %243 {offsets = [0, 64], sizes = [4, 32], strides = [1, 1]} : vector<4x128xf32> to vector<4x32xf32>
    %255 = vector.extract_strided_slice %243 {offsets = [0, 96], sizes = [4, 32], strides = [1, 1]} : vector<4x128xf32> to vector<4x32xf32>
    %cst_88 = arith.constant 5.000000e-01 : f32
    %256 = vector.broadcast %cst_88 : f32 to vector<4x32xf32>
    %257 = arith.mulf %256, %255 : vector<4x32xf32>
    %cst_89 = arith.constant 5.000000e-01 : f32
    %258 = vector.broadcast %cst_89 : f32 to vector<4x32xf32>
    %259 = arith.addf %257, %258 : vector<4x32xf32>
    %260 = arith.mulf %253, %202 : vector<4x32xf32>
    %261 = arith.mulf %248, %254 : vector<4x32xf32>
    %262 = arith.addf %260, %261 : vector<4x32xf32>
    %263 = math.tanh %262 : vector<4x32xf32>
    %264 = arith.mulf %259, %263 : vector<4x32xf32>
    %265 = vector.extract_strided_slice %23 {offsets = [3, 0], sizes = [1, 32], strides = [1, 1]} : vector<8x32xf32> to vector<1x32xf32>
    %266 = vector.broadcast %265 : vector<1x32xf32> to vector<4x32xf32>
    %267 = arith.mulf %264, %266 : vector<4x32xf32>
    %268 = arith.addf %208, %267 : vector<4x32xf32>
    %269 = vector.extract_strided_slice %17 {offsets = [0, 1024], sizes = [4, 256], strides = [1, 1]} : vector<4x2048xf32> to vector<4x256xf32>
    %270 = arith.truncf %236 : vector<4x64xf32> to vector<4x64xbf16>
    %cst_90 = arith.constant dense<0.000000e+00> : vector<4x256xf32>
    %271 = tpu.matmul %270, %18, %cst_90 {dimension_numbers = #tpu.dot_dimension_numbers<[1], [0], [0], [1], [0, 0, 1, 1], [], []>} : vector<4x64xbf16>, vector<64x256xbf16>, vector<4x256xf32> -> vector<4x256xf32>
    %272 = arith.addf %269, %271 : vector<4x256xf32>
    %cst_91 = arith.constant 5.000000e-01 : f32
    %273 = vector.broadcast %cst_91 : f32 to vector<4x256xf32>
    %274 = arith.mulf %273, %272 : vector<4x256xf32>
    %275 = math.tanh %274 : vector<4x256xf32>
    %276 = vector.extract_strided_slice %275 {offsets = [0, 0], sizes = [4, 64], strides = [1, 1]} : vector<4x256xf32> to vector<4x64xf32>
    %cst_92 = arith.constant 5.000000e-01 : f32
    %277 = vector.broadcast %cst_92 : f32 to vector<4x64xf32>
    %278 = arith.mulf %277, %276 : vector<4x64xf32>
    %cst_93 = arith.constant 5.000000e-01 : f32
    %279 = vector.broadcast %cst_93 : f32 to vector<4x64xf32>
    %280 = arith.addf %278, %279 : vector<4x64xf32>
    %281 = vector.extract_strided_slice %275 {offsets = [0, 64], sizes = [4, 64], strides = [1, 1]} : vector<4x256xf32> to vector<4x64xf32>
    %cst_94 = arith.constant 5.000000e-01 : f32
    %282 = vector.broadcast %cst_94 : f32 to vector<4x64xf32>
    %283 = arith.mulf %282, %281 : vector<4x64xf32>
    %cst_95 = arith.constant 5.000000e-01 : f32
    %284 = vector.broadcast %cst_95 : f32 to vector<4x64xf32>
    %285 = arith.addf %283, %284 : vector<4x64xf32>
    %286 = vector.extract_strided_slice %275 {offsets = [0, 128], sizes = [4, 64], strides = [1, 1]} : vector<4x256xf32> to vector<4x64xf32>
    %287 = vector.extract_strided_slice %275 {offsets = [0, 192], sizes = [4, 64], strides = [1, 1]} : vector<4x256xf32> to vector<4x64xf32>
    %cst_96 = arith.constant 5.000000e-01 : f32
    %288 = vector.broadcast %cst_96 : f32 to vector<4x64xf32>
    %289 = arith.mulf %288, %287 : vector<4x64xf32>
    %cst_97 = arith.constant 5.000000e-01 : f32
    %290 = vector.broadcast %cst_97 : f32 to vector<4x64xf32>
    %291 = arith.addf %289, %290 : vector<4x64xf32>
    %292 = arith.mulf %285, %234 : vector<4x64xf32>
    %293 = arith.mulf %280, %286 : vector<4x64xf32>
    %294 = arith.addf %292, %293 : vector<4x64xf32>
    %295 = math.tanh %294 : vector<4x64xf32>
    %296 = arith.mulf %291, %295 : vector<4x64xf32>
    %297 = tpu.concatenate %296, %264 in 1 : vector<4x64xf32>, vector<4x32xf32> -> vector<4x96xf32>
    %298 = arith.truncf %297 : vector<4x96xf32> to vector<4x96xbf16>
    %cst_98 = arith.constant dense<0.000000e+00> : vector<4x128xf32>
    %299 = tpu.matmul %298, %19, %cst_98 {dimension_numbers = #tpu.dot_dimension_numbers<[1], [0], [0], [1], [0, 0, 1, 1], [], []>} : vector<4x96xbf16>, vector<96x128xbf16>, vector<4x128xf32> -> vector<4x128xf32>
    %300 = arith.addf %299, %22 : vector<4x128xf32>
    %cst_99 = arith.constant 5.000000e-01 : f32
    %301 = vector.broadcast %cst_99 : f32 to vector<4x128xf32>
    %302 = arith.mulf %301, %300 : vector<4x128xf32>
    %303 = math.tanh %302 : vector<4x128xf32>
    %304 = vector.extract_strided_slice %303 {offsets = [0, 0], sizes = [4, 32], strides = [1, 1]} : vector<4x128xf32> to vector<4x32xf32>
    %cst_100 = arith.constant 5.000000e-01 : f32
    %305 = vector.broadcast %cst_100 : f32 to vector<4x32xf32>
    %306 = arith.mulf %305, %304 : vector<4x32xf32>
    %cst_101 = arith.constant 5.000000e-01 : f32
    %307 = vector.broadcast %cst_101 : f32 to vector<4x32xf32>
    %308 = arith.addf %306, %307 : vector<4x32xf32>
    %309 = vector.extract_strided_slice %303 {offsets = [0, 32], sizes = [4, 32], strides = [1, 1]} : vector<4x128xf32> to vector<4x32xf32>
    %cst_102 = arith.constant 5.000000e-01 : f32
    %310 = vector.broadcast %cst_102 : f32 to vector<4x32xf32>
    %311 = arith.mulf %310, %309 : vector<4x32xf32>
    %cst_103 = arith.constant 5.000000e-01 : f32
    %312 = vector.broadcast %cst_103 : f32 to vector<4x32xf32>
    %313 = arith.addf %311, %312 : vector<4x32xf32>
    %314 = vector.extract_strided_slice %303 {offsets = [0, 64], sizes = [4, 32], strides = [1, 1]} : vector<4x128xf32> to vector<4x32xf32>
    %315 = vector.extract_strided_slice %303 {offsets = [0, 96], sizes = [4, 32], strides = [1, 1]} : vector<4x128xf32> to vector<4x32xf32>
    %cst_104 = arith.constant 5.000000e-01 : f32
    %316 = vector.broadcast %cst_104 : f32 to vector<4x32xf32>
    %317 = arith.mulf %316, %315 : vector<4x32xf32>
    %cst_105 = arith.constant 5.000000e-01 : f32
    %318 = vector.broadcast %cst_105 : f32 to vector<4x32xf32>
    %319 = arith.addf %317, %318 : vector<4x32xf32>
    %320 = arith.mulf %313, %262 : vector<4x32xf32>
    %321 = arith.mulf %308, %314 : vector<4x32xf32>
    %322 = arith.addf %320, %321 : vector<4x32xf32>
    %323 = math.tanh %322 : vector<4x32xf32>
    %324 = arith.mulf %319, %323 : vector<4x32xf32>
    %325 = vector.extract_strided_slice %23 {offsets = [4, 0], sizes = [1, 32], strides = [1, 1]} : vector<8x32xf32> to vector<1x32xf32>
    %326 = vector.broadcast %325 : vector<1x32xf32> to vector<4x32xf32>
    %327 = arith.mulf %324, %326 : vector<4x32xf32>
    %328 = arith.addf %268, %327 : vector<4x32xf32>
    %329 = vector.extract_strided_slice %17 {offsets = [0, 1280], sizes = [4, 256], strides = [1, 1]} : vector<4x2048xf32> to vector<4x256xf32>
    %330 = arith.truncf %296 : vector<4x64xf32> to vector<4x64xbf16>
    %cst_106 = arith.constant dense<0.000000e+00> : vector<4x256xf32>
    %331 = tpu.matmul %330, %18, %cst_106 {dimension_numbers = #tpu.dot_dimension_numbers<[1], [0], [0], [1], [0, 0, 1, 1], [], []>} : vector<4x64xbf16>, vector<64x256xbf16>, vector<4x256xf32> -> vector<4x256xf32>
    %332 = arith.addf %329, %331 : vector<4x256xf32>
    %cst_107 = arith.constant 5.000000e-01 : f32
    %333 = vector.broadcast %cst_107 : f32 to vector<4x256xf32>
    %334 = arith.mulf %333, %332 : vector<4x256xf32>
    %335 = math.tanh %334 : vector<4x256xf32>
    %336 = vector.extract_strided_slice %335 {offsets = [0, 0], sizes = [4, 64], strides = [1, 1]} : vector<4x256xf32> to vector<4x64xf32>
    %cst_108 = arith.constant 5.000000e-01 : f32
    %337 = vector.broadcast %cst_108 : f32 to vector<4x64xf32>
    %338 = arith.mulf %337, %336 : vector<4x64xf32>
    %cst_109 = arith.constant 5.000000e-01 : f32
    %339 = vector.broadcast %cst_109 : f32 to vector<4x64xf32>
    %340 = arith.addf %338, %339 : vector<4x64xf32>
    %341 = vector.extract_strided_slice %335 {offsets = [0, 64], sizes = [4, 64], strides = [1, 1]} : vector<4x256xf32> to vector<4x64xf32>
    %cst_110 = arith.constant 5.000000e-01 : f32
    %342 = vector.broadcast %cst_110 : f32 to vector<4x64xf32>
    %343 = arith.mulf %342, %341 : vector<4x64xf32>
    %cst_111 = arith.constant 5.000000e-01 : f32
    %344 = vector.broadcast %cst_111 : f32 to vector<4x64xf32>
    %345 = arith.addf %343, %344 : vector<4x64xf32>
    %346 = vector.extract_strided_slice %335 {offsets = [0, 128], sizes = [4, 64], strides = [1, 1]} : vector<4x256xf32> to vector<4x64xf32>
    %347 = vector.extract_strided_slice %335 {offsets = [0, 192], sizes = [4, 64], strides = [1, 1]} : vector<4x256xf32> to vector<4x64xf32>
    %cst_112 = arith.constant 5.000000e-01 : f32
    %348 = vector.broadcast %cst_112 : f32 to vector<4x64xf32>
    %349 = arith.mulf %348, %347 : vector<4x64xf32>
    %cst_113 = arith.constant 5.000000e-01 : f32
    %350 = vector.broadcast %cst_113 : f32 to vector<4x64xf32>
    %351 = arith.addf %349, %350 : vector<4x64xf32>
    %352 = arith.mulf %345, %294 : vector<4x64xf32>
    %353 = arith.mulf %340, %346 : vector<4x64xf32>
    %354 = arith.addf %352, %353 : vector<4x64xf32>
    %355 = math.tanh %354 : vector<4x64xf32>
    %356 = arith.mulf %351, %355 : vector<4x64xf32>
    %357 = tpu.concatenate %356, %324 in 1 : vector<4x64xf32>, vector<4x32xf32> -> vector<4x96xf32>
    %358 = arith.truncf %357 : vector<4x96xf32> to vector<4x96xbf16>
    %cst_114 = arith.constant dense<0.000000e+00> : vector<4x128xf32>
    %359 = tpu.matmul %358, %19, %cst_114 {dimension_numbers = #tpu.dot_dimension_numbers<[1], [0], [0], [1], [0, 0, 1, 1], [], []>} : vector<4x96xbf16>, vector<96x128xbf16>, vector<4x128xf32> -> vector<4x128xf32>
    %360 = arith.addf %359, %22 : vector<4x128xf32>
    %cst_115 = arith.constant 5.000000e-01 : f32
    %361 = vector.broadcast %cst_115 : f32 to vector<4x128xf32>
    %362 = arith.mulf %361, %360 : vector<4x128xf32>
    %363 = math.tanh %362 : vector<4x128xf32>
    %364 = vector.extract_strided_slice %363 {offsets = [0, 0], sizes = [4, 32], strides = [1, 1]} : vector<4x128xf32> to vector<4x32xf32>
    %cst_116 = arith.constant 5.000000e-01 : f32
    %365 = vector.broadcast %cst_116 : f32 to vector<4x32xf32>
    %366 = arith.mulf %365, %364 : vector<4x32xf32>
    %cst_117 = arith.constant 5.000000e-01 : f32
    %367 = vector.broadcast %cst_117 : f32 to vector<4x32xf32>
    %368 = arith.addf %366, %367 : vector<4x32xf32>
    %369 = vector.extract_strided_slice %363 {offsets = [0, 32], sizes = [4, 32], strides = [1, 1]} : vector<4x128xf32> to vector<4x32xf32>
    %cst_118 = arith.constant 5.000000e-01 : f32
    %370 = vector.broadcast %cst_118 : f32 to vector<4x32xf32>
    %371 = arith.mulf %370, %369 : vector<4x32xf32>
    %cst_119 = arith.constant 5.000000e-01 : f32
    %372 = vector.broadcast %cst_119 : f32 to vector<4x32xf32>
    %373 = arith.addf %371, %372 : vector<4x32xf32>
    %374 = vector.extract_strided_slice %363 {offsets = [0, 64], sizes = [4, 32], strides = [1, 1]} : vector<4x128xf32> to vector<4x32xf32>
    %375 = vector.extract_strided_slice %363 {offsets = [0, 96], sizes = [4, 32], strides = [1, 1]} : vector<4x128xf32> to vector<4x32xf32>
    %cst_120 = arith.constant 5.000000e-01 : f32
    %376 = vector.broadcast %cst_120 : f32 to vector<4x32xf32>
    %377 = arith.mulf %376, %375 : vector<4x32xf32>
    %cst_121 = arith.constant 5.000000e-01 : f32
    %378 = vector.broadcast %cst_121 : f32 to vector<4x32xf32>
    %379 = arith.addf %377, %378 : vector<4x32xf32>
    %380 = arith.mulf %373, %322 : vector<4x32xf32>
    %381 = arith.mulf %368, %374 : vector<4x32xf32>
    %382 = arith.addf %380, %381 : vector<4x32xf32>
    %383 = math.tanh %382 : vector<4x32xf32>
    %384 = arith.mulf %379, %383 : vector<4x32xf32>
    %385 = vector.extract_strided_slice %23 {offsets = [5, 0], sizes = [1, 32], strides = [1, 1]} : vector<8x32xf32> to vector<1x32xf32>
    %386 = vector.broadcast %385 : vector<1x32xf32> to vector<4x32xf32>
    %387 = arith.mulf %384, %386 : vector<4x32xf32>
    %388 = arith.addf %328, %387 : vector<4x32xf32>
    %389 = vector.extract_strided_slice %17 {offsets = [0, 1536], sizes = [4, 256], strides = [1, 1]} : vector<4x2048xf32> to vector<4x256xf32>
    %390 = arith.truncf %356 : vector<4x64xf32> to vector<4x64xbf16>
    %cst_122 = arith.constant dense<0.000000e+00> : vector<4x256xf32>
    %391 = tpu.matmul %390, %18, %cst_122 {dimension_numbers = #tpu.dot_dimension_numbers<[1], [0], [0], [1], [0, 0, 1, 1], [], []>} : vector<4x64xbf16>, vector<64x256xbf16>, vector<4x256xf32> -> vector<4x256xf32>
    %392 = arith.addf %389, %391 : vector<4x256xf32>
    %cst_123 = arith.constant 5.000000e-01 : f32
    %393 = vector.broadcast %cst_123 : f32 to vector<4x256xf32>
    %394 = arith.mulf %393, %392 : vector<4x256xf32>
    %395 = math.tanh %394 : vector<4x256xf32>
    %396 = vector.extract_strided_slice %395 {offsets = [0, 0], sizes = [4, 64], strides = [1, 1]} : vector<4x256xf32> to vector<4x64xf32>
    %cst_124 = arith.constant 5.000000e-01 : f32
    %397 = vector.broadcast %cst_124 : f32 to vector<4x64xf32>
    %398 = arith.mulf %397, %396 : vector<4x64xf32>
    %cst_125 = arith.constant 5.000000e-01 : f32
    %399 = vector.broadcast %cst_125 : f32 to vector<4x64xf32>
    %400 = arith.addf %398, %399 : vector<4x64xf32>
    %401 = vector.extract_strided_slice %395 {offsets = [0, 64], sizes = [4, 64], strides = [1, 1]} : vector<4x256xf32> to vector<4x64xf32>
    %cst_126 = arith.constant 5.000000e-01 : f32
    %402 = vector.broadcast %cst_126 : f32 to vector<4x64xf32>
    %403 = arith.mulf %402, %401 : vector<4x64xf32>
    %cst_127 = arith.constant 5.000000e-01 : f32
    %404 = vector.broadcast %cst_127 : f32 to vector<4x64xf32>
    %405 = arith.addf %403, %404 : vector<4x64xf32>
    %406 = vector.extract_strided_slice %395 {offsets = [0, 128], sizes = [4, 64], strides = [1, 1]} : vector<4x256xf32> to vector<4x64xf32>
    %407 = vector.extract_strided_slice %395 {offsets = [0, 192], sizes = [4, 64], strides = [1, 1]} : vector<4x256xf32> to vector<4x64xf32>
    %cst_128 = arith.constant 5.000000e-01 : f32
    %408 = vector.broadcast %cst_128 : f32 to vector<4x64xf32>
    %409 = arith.mulf %408, %407 : vector<4x64xf32>
    %cst_129 = arith.constant 5.000000e-01 : f32
    %410 = vector.broadcast %cst_129 : f32 to vector<4x64xf32>
    %411 = arith.addf %409, %410 : vector<4x64xf32>
    %412 = arith.mulf %405, %354 : vector<4x64xf32>
    %413 = arith.mulf %400, %406 : vector<4x64xf32>
    %414 = arith.addf %412, %413 : vector<4x64xf32>
    %415 = math.tanh %414 : vector<4x64xf32>
    %416 = arith.mulf %411, %415 : vector<4x64xf32>
    %417 = tpu.concatenate %416, %384 in 1 : vector<4x64xf32>, vector<4x32xf32> -> vector<4x96xf32>
    %418 = arith.truncf %417 : vector<4x96xf32> to vector<4x96xbf16>
    %cst_130 = arith.constant dense<0.000000e+00> : vector<4x128xf32>
    %419 = tpu.matmul %418, %19, %cst_130 {dimension_numbers = #tpu.dot_dimension_numbers<[1], [0], [0], [1], [0, 0, 1, 1], [], []>} : vector<4x96xbf16>, vector<96x128xbf16>, vector<4x128xf32> -> vector<4x128xf32>
    %420 = arith.addf %419, %22 : vector<4x128xf32>
    %cst_131 = arith.constant 5.000000e-01 : f32
    %421 = vector.broadcast %cst_131 : f32 to vector<4x128xf32>
    %422 = arith.mulf %421, %420 : vector<4x128xf32>
    %423 = math.tanh %422 : vector<4x128xf32>
    %424 = vector.extract_strided_slice %423 {offsets = [0, 0], sizes = [4, 32], strides = [1, 1]} : vector<4x128xf32> to vector<4x32xf32>
    %cst_132 = arith.constant 5.000000e-01 : f32
    %425 = vector.broadcast %cst_132 : f32 to vector<4x32xf32>
    %426 = arith.mulf %425, %424 : vector<4x32xf32>
    %cst_133 = arith.constant 5.000000e-01 : f32
    %427 = vector.broadcast %cst_133 : f32 to vector<4x32xf32>
    %428 = arith.addf %426, %427 : vector<4x32xf32>
    %429 = vector.extract_strided_slice %423 {offsets = [0, 32], sizes = [4, 32], strides = [1, 1]} : vector<4x128xf32> to vector<4x32xf32>
    %cst_134 = arith.constant 5.000000e-01 : f32
    %430 = vector.broadcast %cst_134 : f32 to vector<4x32xf32>
    %431 = arith.mulf %430, %429 : vector<4x32xf32>
    %cst_135 = arith.constant 5.000000e-01 : f32
    %432 = vector.broadcast %cst_135 : f32 to vector<4x32xf32>
    %433 = arith.addf %431, %432 : vector<4x32xf32>
    %434 = vector.extract_strided_slice %423 {offsets = [0, 64], sizes = [4, 32], strides = [1, 1]} : vector<4x128xf32> to vector<4x32xf32>
    %435 = vector.extract_strided_slice %423 {offsets = [0, 96], sizes = [4, 32], strides = [1, 1]} : vector<4x128xf32> to vector<4x32xf32>
    %cst_136 = arith.constant 5.000000e-01 : f32
    %436 = vector.broadcast %cst_136 : f32 to vector<4x32xf32>
    %437 = arith.mulf %436, %435 : vector<4x32xf32>
    %cst_137 = arith.constant 5.000000e-01 : f32
    %438 = vector.broadcast %cst_137 : f32 to vector<4x32xf32>
    %439 = arith.addf %437, %438 : vector<4x32xf32>
    %440 = arith.mulf %433, %382 : vector<4x32xf32>
    %441 = arith.mulf %428, %434 : vector<4x32xf32>
    %442 = arith.addf %440, %441 : vector<4x32xf32>
    %443 = math.tanh %442 : vector<4x32xf32>
    %444 = arith.mulf %439, %443 : vector<4x32xf32>
    %445 = vector.extract_strided_slice %23 {offsets = [6, 0], sizes = [1, 32], strides = [1, 1]} : vector<8x32xf32> to vector<1x32xf32>
    %446 = vector.broadcast %445 : vector<1x32xf32> to vector<4x32xf32>
    %447 = arith.mulf %444, %446 : vector<4x32xf32>
    %448 = arith.addf %388, %447 : vector<4x32xf32>
    %449 = vector.extract_strided_slice %17 {offsets = [0, 1792], sizes = [4, 256], strides = [1, 1]} : vector<4x2048xf32> to vector<4x256xf32>
    %450 = arith.truncf %416 : vector<4x64xf32> to vector<4x64xbf16>
    %cst_138 = arith.constant dense<0.000000e+00> : vector<4x256xf32>
    %451 = tpu.matmul %450, %18, %cst_138 {dimension_numbers = #tpu.dot_dimension_numbers<[1], [0], [0], [1], [0, 0, 1, 1], [], []>} : vector<4x64xbf16>, vector<64x256xbf16>, vector<4x256xf32> -> vector<4x256xf32>
    %452 = arith.addf %449, %451 : vector<4x256xf32>
    %cst_139 = arith.constant 5.000000e-01 : f32
    %453 = vector.broadcast %cst_139 : f32 to vector<4x256xf32>
    %454 = arith.mulf %453, %452 : vector<4x256xf32>
    %455 = math.tanh %454 : vector<4x256xf32>
    %456 = vector.extract_strided_slice %455 {offsets = [0, 0], sizes = [4, 64], strides = [1, 1]} : vector<4x256xf32> to vector<4x64xf32>
    %cst_140 = arith.constant 5.000000e-01 : f32
    %457 = vector.broadcast %cst_140 : f32 to vector<4x64xf32>
    %458 = arith.mulf %457, %456 : vector<4x64xf32>
    %cst_141 = arith.constant 5.000000e-01 : f32
    %459 = vector.broadcast %cst_141 : f32 to vector<4x64xf32>
    %460 = arith.addf %458, %459 : vector<4x64xf32>
    %461 = vector.extract_strided_slice %455 {offsets = [0, 64], sizes = [4, 64], strides = [1, 1]} : vector<4x256xf32> to vector<4x64xf32>
    %cst_142 = arith.constant 5.000000e-01 : f32
    %462 = vector.broadcast %cst_142 : f32 to vector<4x64xf32>
    %463 = arith.mulf %462, %461 : vector<4x64xf32>
    %cst_143 = arith.constant 5.000000e-01 : f32
    %464 = vector.broadcast %cst_143 : f32 to vector<4x64xf32>
    %465 = arith.addf %463, %464 : vector<4x64xf32>
    %466 = vector.extract_strided_slice %455 {offsets = [0, 128], sizes = [4, 64], strides = [1, 1]} : vector<4x256xf32> to vector<4x64xf32>
    %467 = vector.extract_strided_slice %455 {offsets = [0, 192], sizes = [4, 64], strides = [1, 1]} : vector<4x256xf32> to vector<4x64xf32>
    %cst_144 = arith.constant 5.000000e-01 : f32
    %468 = vector.broadcast %cst_144 : f32 to vector<4x64xf32>
    %469 = arith.mulf %468, %467 : vector<4x64xf32>
    %cst_145 = arith.constant 5.000000e-01 : f32
    %470 = vector.broadcast %cst_145 : f32 to vector<4x64xf32>
    %471 = arith.addf %469, %470 : vector<4x64xf32>
    %472 = arith.mulf %465, %414 : vector<4x64xf32>
    %473 = arith.mulf %460, %466 : vector<4x64xf32>
    %474 = arith.addf %472, %473 : vector<4x64xf32>
    %475 = math.tanh %474 : vector<4x64xf32>
    %476 = arith.mulf %471, %475 : vector<4x64xf32>
    %477 = tpu.concatenate %476, %444 in 1 : vector<4x64xf32>, vector<4x32xf32> -> vector<4x96xf32>
    %478 = arith.truncf %477 : vector<4x96xf32> to vector<4x96xbf16>
    %cst_146 = arith.constant dense<0.000000e+00> : vector<4x128xf32>
    %479 = tpu.matmul %478, %19, %cst_146 {dimension_numbers = #tpu.dot_dimension_numbers<[1], [0], [0], [1], [0, 0, 1, 1], [], []>} : vector<4x96xbf16>, vector<96x128xbf16>, vector<4x128xf32> -> vector<4x128xf32>
    %480 = arith.addf %479, %22 : vector<4x128xf32>
    %cst_147 = arith.constant 5.000000e-01 : f32
    %481 = vector.broadcast %cst_147 : f32 to vector<4x128xf32>
    %482 = arith.mulf %481, %480 : vector<4x128xf32>
    %483 = math.tanh %482 : vector<4x128xf32>
    %484 = vector.extract_strided_slice %483 {offsets = [0, 0], sizes = [4, 32], strides = [1, 1]} : vector<4x128xf32> to vector<4x32xf32>
    %cst_148 = arith.constant 5.000000e-01 : f32
    %485 = vector.broadcast %cst_148 : f32 to vector<4x32xf32>
    %486 = arith.mulf %485, %484 : vector<4x32xf32>
    %cst_149 = arith.constant 5.000000e-01 : f32
    %487 = vector.broadcast %cst_149 : f32 to vector<4x32xf32>
    %488 = arith.addf %486, %487 : vector<4x32xf32>
    %489 = vector.extract_strided_slice %483 {offsets = [0, 32], sizes = [4, 32], strides = [1, 1]} : vector<4x128xf32> to vector<4x32xf32>
    %cst_150 = arith.constant 5.000000e-01 : f32
    %490 = vector.broadcast %cst_150 : f32 to vector<4x32xf32>
    %491 = arith.mulf %490, %489 : vector<4x32xf32>
    %cst_151 = arith.constant 5.000000e-01 : f32
    %492 = vector.broadcast %cst_151 : f32 to vector<4x32xf32>
    %493 = arith.addf %491, %492 : vector<4x32xf32>
    %494 = vector.extract_strided_slice %483 {offsets = [0, 64], sizes = [4, 32], strides = [1, 1]} : vector<4x128xf32> to vector<4x32xf32>
    %495 = vector.extract_strided_slice %483 {offsets = [0, 96], sizes = [4, 32], strides = [1, 1]} : vector<4x128xf32> to vector<4x32xf32>
    %cst_152 = arith.constant 5.000000e-01 : f32
    %496 = vector.broadcast %cst_152 : f32 to vector<4x32xf32>
    %497 = arith.mulf %496, %495 : vector<4x32xf32>
    %cst_153 = arith.constant 5.000000e-01 : f32
    %498 = vector.broadcast %cst_153 : f32 to vector<4x32xf32>
    %499 = arith.addf %497, %498 : vector<4x32xf32>
    %500 = arith.mulf %493, %442 : vector<4x32xf32>
    %501 = arith.mulf %488, %494 : vector<4x32xf32>
    %502 = arith.addf %500, %501 : vector<4x32xf32>
    %503 = math.tanh %502 : vector<4x32xf32>
    %504 = arith.mulf %499, %503 : vector<4x32xf32>
    %505 = vector.extract_strided_slice %23 {offsets = [7, 0], sizes = [1, 32], strides = [1, 1]} : vector<8x32xf32> to vector<1x32xf32>
    %506 = vector.broadcast %505 : vector<1x32xf32> to vector<4x32xf32>
    %507 = arith.mulf %504, %506 : vector<4x32xf32>
    %508 = arith.addf %448, %507 : vector<4x32xf32>
    %cst_154 = arith.constant dense<0.000000e+00> : vector<4xf32>
    %509 = vector.multi_reduction <add>, %508, %cst_154 [1] : vector<4x32xf32> to vector<4xf32>
    %510 = vector.shape_cast %509 : vector<4xf32> to vector<4x1xf32>
    %c0_155 = arith.constant 0 : index
    %c0_156 = arith.constant 0 : index
    %511 = vector.load %arg11[%c0_155, %c0_156] : memref<1x1xf32, #tpu.memory_space<vmem>>, vector<1x1xf32>
    %512 = vector.broadcast %511 : vector<1x1xf32> to vector<4x1xf32>
    %513 = arith.addf %510, %512 : vector<4x1xf32>
    %c0_157 = arith.constant 0 : index
    %c0_158 = arith.constant 0 : index
    %514 = vector.load %arg12[%c0_157, %c0_158] : memref<4x1xf32, #tpu.memory_space<vmem>>, vector<4x1xf32>
    tpu.vector_store %arg12[%c0_157, %c0_158], %513 {strides = array<i32>} : memref<4x1xf32, #tpu.memory_space<vmem>>, vector<4x1xf32>,
    return
  }
  func.func @transform_0(%arg0: i32) -> (i32, i32) {
    %c0_i32 = arith.constant 0 : i32
    %c0_i32_0 = arith.constant 0 : i32
    return %arg0, %c0_i32 : i32, i32
  }
  func.func @transform_1(%arg0: i32) -> (i32, i32) {
    %c0_i32 = arith.constant 0 : i32
    %c0_i32_0 = arith.constant 0 : i32
    return %arg0, %c0_i32 : i32, i32
  }
  func.func @transform_2(%arg0: i32) -> (i32, i32) {
    %c0_i32 = arith.constant 0 : i32
    %c0_i32_0 = arith.constant 0 : i32
    %c0_i32_1 = arith.constant 0 : i32
    return %c0_i32, %c0_i32_0 : i32, i32
  }
  func.func @transform_3(%arg0: i32) -> (i32, i32) {
    %c0_i32 = arith.constant 0 : i32
    %c0_i32_0 = arith.constant 0 : i32
    %c0_i32_1 = arith.constant 0 : i32
    return %c0_i32, %c0_i32_0 : i32, i32
  }
  func.func @transform_4(%arg0: i32) -> (i32, i32) {
    %c0_i32 = arith.constant 0 : i32
    %c0_i32_0 = arith.constant 0 : i32
    %c0_i32_1 = arith.constant 0 : i32
    return %c0_i32, %c0_i32_0 : i32, i32
  }
  func.func @transform_5(%arg0: i32) -> (i32, i32) {
    %c0_i32 = arith.constant 0 : i32
    %c0_i32_0 = arith.constant 0 : i32
    %c0_i32_1 = arith.constant 0 : i32
    return %c0_i32, %c0_i32_0 : i32, i32
  }
  func.func @transform_6(%arg0: i32) -> (i32, i32) {
    %c0_i32 = arith.constant 0 : i32
    %c0_i32_0 = arith.constant 0 : i32
    %c0_i32_1 = arith.constant 0 : i32
    return %c0_i32, %c0_i32_0 : i32, i32
  }
  func.func @transform_7(%arg0: i32) -> (i32, i32) {
    %c0_i32 = arith.constant 0 : i32
    %c0_i32_0 = arith.constant 0 : i32
    %c0_i32_1 = arith.constant 0 : i32
    return %c0_i32, %c0_i32_0 : i32, i32
  }
  func.func @transform_8(%arg0: i32) -> (i32, i32) {
    %c0_i32 = arith.constant 0 : i32
    %c0_i32_0 = arith.constant 0 : i32
    %c0_i32_1 = arith.constant 0 : i32
    return %c0_i32, %c0_i32_0 : i32, i32
  }
  func.func @transform_9(%arg0: i32) -> (i32, i32) {
    %c0_i32 = arith.constant 0 : i32
    %c0_i32_0 = arith.constant 0 : i32
    %c0_i32_1 = arith.constant 0 : i32
    return %c0_i32, %c0_i32_0 : i32, i32
  }
  func.func @transform_10(%arg0: i32) -> (i32, i32) {
    %c0_i32 = arith.constant 0 : i32
    %c0_i32_0 = arith.constant 0 : i32
    %c0_i32_1 = arith.constant 0 : i32
    return %c0_i32, %c0_i32_0 : i32, i32
  }
  func.func @transform_11(%arg0: i32) -> (i32, i32) {
    %c0_i32 = arith.constant 0 : i32
    %c0_i32_0 = arith.constant 0 : i32
    return %arg0, %c0_i32 : i32, i32
  }
}

</mosaic_0001>

<bundles_post_ra>
// kernel: mv_lstm_supervised_forward.1
= control target key start
LH: loop header
LB: loop body
LE: loop exit
PB: predicated region body
PF: predicated region fallthrough
CT: control target
= control target key end

     0   :  { %s3054_s0 = inlined_call_operand.vmem [shape: f32[4,32], index: 0, kind: input, shape index: {}]   ;;  %s3055_s1 = inlined_call_operand.vmem [shape: f32[4,1], index: 1, kind: input, shape index: {}]   ;;  %s3056_s2 = inlined_call_operand.vmem [shape: bf16[32,32], index: 2, kind: input, shape index: {}]   ;;  %s3057_s3 = inlined_call_operand.vmem [shape: f32[1,32], index: 3, kind: input, shape index: {}]   ;;  %s3058_s4 = inlined_call_operand.vmem [shape: f32[1,32], index: 4, kind: input, shape index: {}]   ;;  %s3059_s5 = inlined_call_operand.hbm [shape: bf16[32,2048], index: 5, kind: input, shape index: {}]   ;;  %s3060_s6 = inlined_call_operand.vmem [shape: bf16[64,256], index: 6, kind: input, shape index: {}]   ;;  %s3061_s7 = inlined_call_operand.hbm [shape: bf16[96,128], index: 7, kind: input, shape index: {}]   ;;  %s3062_s8 = inlined_call_operand.vmem [shape: f32[1,128], index: 8, kind: input, shape index: {}]   ;;  %s3063_s9 = inlined_call_operand.vmem [shape: f32[8,32], index: 9, kind: input, shape index: {}]   ;;  %s3064_s10 = inlined_call_operand.<no memory space> [shape: f32[1,1], index: 10, kind: input, shape index: {}]   ;;  %s3065_s11 = inlined_call_operand.vmem [shape: f32[4,1], index: 11, kind: output, shape index: {}]  }
   0x1   :  { %v16_v0 = vstv %s3064_s10 }
   0x2   :  { %17 = vst [vmem:[#allocation2] sm:$0x1] %v16_v0 }
   0x3   :  { %18 = vsyncpa [#allocation4], 0 }
   0x4   :  { %19 = vsyncpa [#allocation6], 0  ;;  %s2442_s19 = smov [#allocation3]  }
   0x5   :  { %s35_s20 = sshll.u32 %s2442_s19, 4  ;;  %s36_s20 = int_to_ptr.vmem [resolvable:$true] %s35_s20 }
   0x6   :  { %s2406_s21 = scalar_lea.vmem %s36_s20, 4096  ;;  %p2411_p1 = scmp.lt.s32.totalorder %s36_s20, %s36_s20 }
   0x7   :  { %p2407_p0 = scmp.ne.s32.totalorder %s36_s20, %s2406_s21  ;;  %p2412_p2 = scmp.lt.s32.totalorder %s2406_s21, %s2406_s21 }
   0x9   :  { %p2413_p3 = por %p2412_p2, %p2411_p1 }
   0xb   :  { %p2414_p4 = pnand %p2413_p3, %p2407_p0 }
   0xd   :  { %2417 = shalt.err (!%p2414_p4)
}
   0xe   :  { %s2443_s22 = smov 1024   ;;  %s2444_s23 = smov 64  }
   0xf   :  { %41 = dma.hbm_to_vmem [thread:$0]  %s3059_s5, 4096, %s36_s20, [#allocation4], %s2443_s22, %s2443_s22, %s2444_s23  }
  0x10   :  { %s2445_s10 = smov [#allocation5]  }
  0x11   :  { %s49_s26 = sshll.u32 %s2445_s10, 4  ;;  %s50_s26 = int_to_ptr.vmem [resolvable:$true] %s49_s26 }
  0x12   :  { %s2426_s27 = scalar_lea.vmem %s50_s26, 768  ;;  %p2431_p6 = scmp.lt.s32.totalorder %s50_s26, %s50_s26 }
  0x13   :  { %p2427_p5 = scmp.ne.s32.totalorder %s50_s26, %s2426_s27  ;;  %p2432_p7 = scmp.lt.s32.totalorder %s2426_s27, %s2426_s27 }
  0x15   :  { %p2433_p8 = por %p2432_p7, %p2431_p6 }
  0x17   :  { %p2434_p9 = pnand %p2433_p8, %p2427_p5 }
  0x19   :  { %2437 = shalt.err (!%p2434_p9)
}
  0x1a   :  { %s2446_s28 = smov 4  }
  0x1b   :  { %55 = dma.hbm_to_vmem [thread:$0]  %s3061_s7, 768, %s50_s26, [#allocation6], %s2444_s23, %s2444_s23, %s2446_s28  }
  0x1c   :  { %2438 = dma.done.wait [#allocation4], 4096  }
  0x1d   :  { %2439 = vsyncadd [#allocation4], 4294963200 }
  0x1e   :  { %2440 = dma.done.wait [#allocation6], 768  }
  0x1f   :  { %2441 = vsyncadd [#allocation6], 4294966528  ;;  %v2447_v1 = vmov 0.0   ;;  %vm2448_vm0 = vmmov 0   ;;  %v2449_v2 = vmov 0   ;;  %v2290_v3 = vld [vmem:[%s3056_s2 + $0x8] sm:$0xff]  }
  0x20   :  { %2143 = vmatprep.subr.bf16.mxu1 %v2447_v1  ;;  %2147 = vmatprep.mubr.msk.bf16.mxu1 %vm2448_vm0, %v2447_v1  ;;  %v2291_v4 = vld [vmem:[%s3056_s2] sm:$0xff]   ;;  %vm101_vm1 = vcmask 261120   ;;  %v172_v11 = vld [vmem:[#allocation3 + $0x88] sm:$0xff]  ;;  %v173_v24 = vld [vmem:[#allocation3 + $0x90] sm:$0xff]  ;;  %vm746_vm2 = vcmask 523264   ;;  %vm852_vm3 = vcmask 785408  }
  0x21   :  { %2289 = vset.pattern.permute.xlu0 %v2449_v2  ;;  %423 = vmatprep.mubr.bf16.mxu0 %v2449_v2  ;;  %v69_v5 = vld [vmem:[%s3054_s0] sm:$0xf]  ;;  %v180_v12 = vld [vmem:[#allocation3 + $0xc8] sm:$0xff]  ;;  %v181_v25 = vld [vmem:[#allocation3 + $0xd0] sm:$0xff]  ;;  %s2450_s14 = smov 32   ;;  %s2451_s15 = smov 96  }
  0x22   :  { %2144 = vmatpush3.bf16.msra.mxu1 %v2290_v3  ;;  %v70_v6 = vld [vmem:[%s3055_s1] sm:$0xf]  ;;  %v71_v7 = vpack.c.bf16 %v69_v5, %v69_v5  ;;  %v2032_v14 = vcombine.high %v172_v11, %v180_v12  ;;  %v2031_v15 = vcombine.low %v172_v11, %v180_v12  ;;  %v156_v19 = vld [vmem:[#allocation3 + $0x8] sm:$0xff]  ;;  %v2034_v26 = vcombine.high %v173_v24, %v181_v25  ;;  %v157_v40 = vld [vmem:[#allocation3 + $0x10] sm:$0xff] }
  0x23   :  { %2145 = vmatprep.subr.bf16.mxu1 %v2447_v1  ;;  %79 = vperm.xlu0 %2289, %v70_v6   ;;  %v171_v8 = vld [vmem:[#allocation3 + $0x80] sm:$0xff]  ;;  %v164_v20 = vld [vmem:[#allocation3 + $0x48] sm:$0xff]  ;;  %v2033_v27 = vcombine.low %v173_v24, %v181_v25  ;;  %v174_v28 = vld [vmem:[#allocation3 + $0x98] sm:$0xff]  ;;  %vm1988_vm4 = vcmask 257024   ;;  %vm2000_vm5 = vcmask 3072  }
  0x24   :  { %v179_v9 = vld [vmem:[#allocation3 + $0xc0] sm:$0xff]  ;;  %403 = vmatprep.subr.bf16.mxu0 %v2032_v14  ;;  %v2016_v22 = vcombine.high %v156_v19, %v164_v20  ;;  %v2015_v23 = vcombine.low %v156_v19, %v164_v20  ;;  %v182_v29 = vld [vmem:[#allocation3 + $0xd8] sm:$0xff]  ;;  %v165_v42 = vld [vmem:[#allocation3 + $0x50] sm:$0xff] }
  0x25   :  { %v2030_v10 = vcombine.high %v171_v8, %v179_v9  ;;  %v2029_v13 = vcombine.low %v171_v8, %v179_v9  ;;  %v155_v16 = vld [vmem:[#allocation3] sm:$0xff]  ;;  %404 = vmatpush1.bf16.msra.mxu0 %v2031_v15  ;;  %v2036_v30 = vcombine.high %v174_v28, %v182_v29  ;;  %v2035_v31 = vcombine.low %v174_v28, %v182_v29  ;;  %v2008_v32 = vld [vmem:[%s3057_s3] ss:$0 sm:$0xff]  ;;  %v176_v52 = vld [vmem:[#allocation3 + $0xa8] sm:$0xff] }
  0x26   :  { %2146 = vmatpush3.bf16.msra.mxu1 %v2291_v4  ;;  %v163_v17 = vld [vmem:[#allocation3 + $0x40] sm:$0xff]  ;;  %405 = vmatprep.subr.bf16.mxu0 %v2016_v22  ;;  %v2012_v36 = vld [vmem:[%s3058_s4] ss:$0 sm:$0xff]  ;;  %v2018_v48 = vcombine.high %v157_v40, %v165_v42  ;;  %v184_v53 = vld [vmem:[#allocation3 + $0xe8] sm:$0xff]  ;;  %v2017_v54 = vcombine.low %v157_v40, %v165_v42 }
  0x27   :  { %362 = vmatprep.subr.bf16.mxu1 %v2030_v10  ;;  %v2014_v18 = vcombine.high %v155_v16, %v163_v17  ;;  %v2013_v21 = vcombine.low %v155_v16, %v163_v17  ;;  %v158_v43 = vld [vmem:[#allocation3 + $0x18] sm:$0xff]  ;;  %v175_v50 = vld [vmem:[#allocation3 + $0xa0] sm:$0xff]  ;;  %v2040_v57 = vcombine.high %v176_v52, %v184_v53  ;;  %v160_v60 = vld [vmem:[#allocation3 + $0x28] sm:$0xff]  ;;  %v2039_v63 = vcombine.low %v176_v52, %v184_v53 }
  0x28   :  { %v166_v44 = vld [vmem:[#allocation3 + $0x58] sm:$0xff]  ;;  %v183_v51 = vld [vmem:[#allocation3 + $0xe0] sm:$0xff]  ;;  %v168_v61 = vld [vmem:[#allocation3 + $0x68] sm:$0xff] }
  0x29   :  { %2148 = vmatmul.mubr.msk.bf16.vlgmr.msra.gmra.mxu1 %vm101_vm1, %v71_v7  ;;  %406 = vmatpush1.bf16.msra.mxu0 %v2015_v23  ;;  %v2020_v49 = vcombine.high %v158_v43, %v166_v44  ;;  %v2019_v55 = vcombine.low %v158_v43, %v166_v44  ;;  %v2038_v56 = vcombine.high %v175_v50, %v183_v51  ;;  %v159_v58 = vld [vmem:[#allocation3 + $0x20] sm:$0xff]  ;;  %v177_v4 = vld [vmem:[#allocation3 + $0xb0] sm:$0xff]  ;;  %v178_v6 = vld [vmem:[#allocation3 + $0xb8] sm:$0xff] }
  0x2a   :  { %382 = vmatprep.mubr.bf16.mxu1 %v2449_v2  ;;  %363 = vmatpush1.bf16.msra.mxu1 %v2029_v13  ;;  %v167_v59 = vld [vmem:[#allocation3 + $0x60] sm:$0xff]  ;;  %v2037_v62 = vcombine.low %v175_v50, %v183_v51  ;;  %v2024_v3 = vcombine.high %v160_v60, %v168_v61  ;;  %v185_v5 = vld [vmem:[#allocation3 + $0xf0] sm:$0xff]  ;;  %v186_v7 = vld [vmem:[#allocation3 + $0xf8] sm:$0xff]  ;;  %v2023_v9 = vcombine.low %v160_v60, %v168_v61 }
  0x2b   :  { %364 = vmatprep.subr.bf16.mxu1 %v2014_v18  ;;  %485 = vmatprep.subr.bf16.mxu0 %v2036_v30  ;;  %v2022_v0 = vcombine.high %v159_v58, %v167_v59  ;;  %v2021_v8 = vcombine.low %v159_v58, %v167_v59  ;;  %v2042_v10 = vcombine.high %v177_v4, %v185_v5  ;;  %v161_v12 = vld [vmem:[#allocation3 + $0x30] sm:$0xff]  ;;  %v162_v14 = vld [vmem:[#allocation3 + $0x38] sm:$0xff]  ;;  %v2584_v24 = vld [vmem:[%s3060_s6 + $0x24] ss:$8 sps:$4 sm:$0xff]  }
  0x2c   :  { %v2044_v11 = vcombine.high %v178_v6, %v186_v7  ;;  %v169_v13 = vld [vmem:[#allocation3 + $0x70] sm:$0xff]  ;;  %v170_v15 = vld [vmem:[#allocation3 + $0x78] sm:$0xff]  ;;  %v2041_v16 = vcombine.low %v177_v4, %v185_v5  ;;  %v2043_v17 = vcombine.low %v178_v6, %v186_v7  ;;  %v2616_v28 = vld [vmem:[%s3060_s6 + $0x4] ss:$8 sps:$4 sm:$0xff]  }
  0x2d   :  { %v2026_v18 = vcombine.high %v161_v12, %v169_v13  ;;  %v2028_v19 = vcombine.high %v162_v14, %v170_v15  ;;  %v2025_v20 = vcombine.low %v161_v12, %v169_v13  ;;  %v2571_v22 = vld [vmem:[%s3060_s6 + $0x34] ss:$8 sps:$4 sm:$0xff]   ;;  %v2578_v23 = vld [vmem:[%s3060_s6 + $0x30] ss:$8 sps:$4 sm:$0xff]   ;;  %v2595_v25 = vld [vmem:[%s3060_s6 + $0x20] ss:$8 sps:$4 sm:$0xff]  }
  0x2e   :  { %365 = vmatpush1.bf16.msra.mxu1 %v2013_v21  ;;  %v2027_v21 = vcombine.low %v162_v14, %v170_v15  ;;  %v2622_v29 = vld [vmem:[%s3060_s6] ss:$8 sps:$4 sm:$0xff]  }
  0x2f   :  { %444 = vmatprep.subr.bf16.mxu1 %v2034_v26  ;;  %v2602_v26 = vld [vmem:[%s3060_s6 + $0x14] ss:$8 sps:$4 sm:$0xff]   ;;  %v2666_v13 = vld [vmem:[#allocation5 + $0x28] sm:$0xff]   ;;  %v2669_v14 = vld [vmem:[#allocation5 + $0x20] sm:$0xff]  }
  0x30   :  { %v2673_v15 = vld [vmem:[#allocation5 + $0x18] sm:$0xff]  }
  0x9e   :  { %v80_v33 = vpop.permute.xlu0 %79 }
  0x9f   :  { %v88_v34 = vmul.f32 %v2008_v32, %v80_v33 }
  0xe9   :  { %v139_v35 = vpop.f32.mrf.mxu1 }
  0xea   :  { %v140_v37 = vadd.f32 %v139_v35, %v88_v34 }
  0xeb   :  { %v2149_v38 = vpop.f32.mrf.mxu1 }
  0xec   :  { %v152_v39 = vadd.f32 %v2012_v36, %v140_v37 }
  0xed   :  { %v142_v41 = vpop.f32.mrf.mxu1 }
  0xee   :  { %v153_v45 = vmax.f32 %v152_v39, 0.0 }
  0xef   :  { %v2150_v46 = vpop.f32.mrf.mxu1 }
  0xf0   :  { %v2550_v47 = vpack.c.bf16 %v153_v45, %v153_v45 }
  0xf2   :  { %2045 = vmatmul.mubr.msk.bf16.vlgmr.msra.gmra.mxu1 %vm101_vm1, %v2550_v47  ;;  %2046 = vmatmul.mubr.msk.bf16.vlgmr.msra.gmra.mxu0 %vm101_vm1, %v2550_v47 }
  0xf3   :  { %445 = vmatpush1.bf16.msra.mxu1 %v2033_v27  ;;  %486 = vmatpush1.bf16.msra.mxu0 %v2035_v31  ;;  %v2610_v27 = vld [vmem:[%s3060_s6 + $0x10] ss:$8 sps:$4 sm:$0xff]  }
  0xf4   :  { %446 = vmatprep.subr.bf16.mxu1 %v2018_v48  ;;  %487 = vmatprep.subr.bf16.mxu0 %v2020_v49 }
  0xf5   :  { %464 = vmatprep.mubr.bf16.mxu1 %v2449_v2  ;;  %505 = vmatprep.mubr.bf16.mxu0 %v2449_v2 }
  0xf7   :  { %447 = vmatpush1.bf16.msra.mxu1 %v2017_v54  ;;  %488 = vmatpush1.bf16.msra.mxu0 %v2019_v55 }
  0xf8   :  { %526 = vmatprep.subr.bf16.mxu1 %v2038_v56  ;;  %567 = vmatprep.subr.bf16.mxu0 %v2040_v57 }
  0xfa   :  { %2047 = vmatmul.mubr.msk.bf16.vlgmr.msra.gmra.mxu1 %vm101_vm1, %v2550_v47  ;;  %2048 = vmatmul.mubr.msk.bf16.vlgmr.msra.gmra.mxu0 %vm101_vm1, %v2550_v47 }
  0xfb   :  { %527 = vmatpush1.bf16.msra.mxu1 %v2037_v62  ;;  %568 = vmatpush1.bf16.msra.mxu0 %v2039_v63 }
  0xfc   :  { %528 = vmatprep.subr.bf16.mxu1 %v2022_v0  ;;  %569 = vmatprep.subr.bf16.mxu0 %v2024_v3 }
  0xfd   :  { %546 = vmatprep.mubr.bf16.mxu1 %v2449_v2  ;;  %587 = vmatprep.mubr.bf16.mxu0 %v2449_v2 }
  0xff   :  { %529 = vmatpush1.bf16.msra.mxu1 %v2021_v8  ;;  %570 = vmatpush1.bf16.msra.mxu0 %v2023_v9 }
 0x100   :  { %608 = vmatprep.subr.bf16.mxu1 %v2042_v10  ;;  %649 = vmatprep.subr.bf16.mxu0 %v2044_v11 }
 0x102   :  { %2049 = vmatmul.mubr.msk.bf16.vlgmr.msra.gmra.mxu1 %vm101_vm1, %v2550_v47  ;;  %2050 = vmatmul.mubr.msk.bf16.vlgmr.msra.gmra.mxu0 %vm101_vm1, %v2550_v47 }
 0x103   :  { %609 = vmatpush1.bf16.msra.mxu1 %v2041_v16  ;;  %650 = vmatpush1.bf16.msra.mxu0 %v2043_v17  ;;  %v2677_v16 = vld [vmem:[#allocation5 + $0x10] sm:$0xff]   ;;  %v2681_v17 = vld [vmem:[#allocation5 + $0x8] sm:$0xff]  }
 0x104   :  { %610 = vmatprep.subr.bf16.mxu1 %v2026_v18  ;;  %651 = vmatprep.subr.bf16.mxu0 %v2028_v19 }
 0x105   :  { %628 = vmatprep.mubr.bf16.mxu1 %v2449_v2  ;;  %669 = vmatprep.mubr.bf16.mxu0 %v2449_v2 }
 0x107   :  { %611 = vmatpush1.bf16.msra.mxu1 %v2025_v20  ;;  %652 = vmatpush1.bf16.msra.mxu0 %v2027_v21  ;;  %v2689_v21 = vld [vmem:[#allocation5] sm:$0xff]  }
 0x108   :  { %758 = vmatprep.subr.bf16.mxu1 %v2571_v22  ;;  %2151 = vmatprep.subr.bf16.mxu0 %v2447_v1 }
 0x10a   :  { %2051 = vmatmul.mubr.msk.bf16.vlgmr.msra.gmra.mxu1 %vm101_vm1, %v2550_v47  ;;  %2052 = vmatmul.mubr.msk.bf16.vlgmr.msra.gmra.mxu0 %vm101_vm1, %v2550_v47 }
 0x10b   :  { %759 = vmatpush1.bf16.msra.mxu1 %v2578_v23  ;;  %782 = vmatprep.mubr.bf16.mxu1 %v2449_v2 }
 0x10c   :  { %760 = vmatprep.subr.bf16.mxu1 %v2584_v24  ;;  %2163 = vmatprep.mubr.msk.bf16.mxu0 %vm2448_vm0, %v2447_v1 }
 0x10d   :  { %2152 = vmatpush3.bf16.msra.mxu0 %v2666_v13 }
 0x10e   :  { %2153 = vmatprep.subr.bf16.mxu0 %v2447_v1 }
 0x10f   :  { %761 = vmatpush1.bf16.msra.mxu1 %v2595_v25 }
 0x110   :  { %762 = vmatprep.subr.bf16.mxu1 %v2602_v26 }
 0x111   :  { %2154 = vmatpush3.bf16.msra.mxu0 %v2669_v14 }
 0x112   :  { %2155 = vmatprep.subr.bf16.mxu0 %v2447_v1 }
 0x113   :  { %763 = vmatpush1.bf16.msra.mxu1 %v2610_v27 }
 0x114   :  { %764 = vmatprep.subr.bf16.mxu1 %v2616_v28 }
 0x115   :  { %2156 = vmatpush3.bf16.msra.mxu0 %v2673_v15 }
 0x116   :  { %2157 = vmatprep.subr.bf16.mxu0 %v2447_v1 }
 0x117   :  { %765 = vmatpush1.bf16.msra.mxu1 %v2622_v29 }
 0x118   :  { %942 = vmatprep.subr.bf16.mxu1 %v2571_v22 }
 0x119   :  { %2158 = vmatpush3.bf16.msra.mxu0 %v2677_v16 }
 0x11a   :  { %783 = vmatmul.mubr.bf16.vlgmr.msra.gmra.mxu1 %v2449_v2  ;;  %2159 = vmatprep.subr.bf16.mxu0 %v2447_v1 }
 0x11b   :  { %943 = vmatpush1.bf16.msra.mxu1 %v2578_v23  ;;  %966 = vmatprep.mubr.bf16.mxu1 %v2449_v2 }
 0x11c   :  { %944 = vmatprep.subr.bf16.mxu1 %v2584_v24 }
 0x11d   :  { %2160 = vmatpush3.bf16.msra.mxu0 %v2681_v17 }
 0x11e   :  { %2161 = vmatprep.subr.bf16.mxu0 %v2447_v1 }
 0x11f   :  { %945 = vmatpush1.bf16.msra.mxu1 %v2595_v25 }
 0x120   :  { %946 = vmatprep.subr.bf16.mxu1 %v2602_v26 }
 0x121   :  { %2162 = vmatpush3.bf16.msra.mxu0 %v2689_v21 }
 0x122   :  { %2167 = vmatprep.subr.bf16.mxu0 %v2447_v1 }
 0x123   :  { %947 = vmatpush1.bf16.msra.mxu1 %v2610_v27 }
 0x124   :  { %948 = vmatprep.subr.bf16.mxu1 %v2616_v28 }
 0x127   :  { %949 = vmatpush1.bf16.msra.mxu1 %v2622_v29 }
 0x128   :  { %1093 = vmatprep.subr.bf16.mxu1 %v2571_v22 }
 0x1b2   :  { %v384_v30 = vpop.f32.mrf.mxu1  ;;  %v2637_v31 = vpop.f32.mrf.mxu0 }
 0x1b4   :  { %v386_v32 = vpop.f32.mrf.mxu1  ;;  %v2639_v33 = vpop.f32.mrf.mxu0 }
 0x1b6   :  { %v388_v34 = vpop.f32.mrf.mxu1  ;;  %v429_v35 = vpop.f32.mrf.mxu0 }
 0x1b8   :  { %v389_v36 = vpop.f32.mrf.mxu1  ;;  %v430_v37 = vpop.f32.mrf.mxu0 }
 0x1ba   :  { %v2641_v38 = vpop.f32.mrf.mxu1  ;;  %v2643_v39 = vpop.f32.mrf.mxu0 }
 0x1bc   :  { %v2645_v40 = vpop.f32.mrf.mxu1  ;;  %v2647_v41 = vpop.f32.mrf.mxu0 }
 0x1be   :  { %v470_v42 = vpop.f32.mrf.mxu1  ;;  %v511_v43 = vpop.f32.mrf.mxu0 }
 0x1c0   :  { %v471_v44 = vpop.f32.mrf.mxu1  ;;  %v512_v45 = vpop.f32.mrf.mxu0 }
 0x1c1   :  { %v2724_v45 = vld [vmem:[%s3062_s8] ss:$0 sm:$0xff] }
 0x1c2   :  { %v2649_v46 = vpop.f32.mrf.mxu1  ;;  %v2651_v47 = vpop.f32.mrf.mxu0 }
 0x1c4   :  { %v2653_v48 = vpop.f32.mrf.mxu1  ;;  %v2655_v49 = vpop.f32.mrf.mxu0 }
 0x1c6   :  { %v552_v50 = vpop.f32.mrf.mxu1  ;;  %v593_v51 = vpop.f32.mrf.mxu0 }
 0x1c8   :  { %v553_v52 = vpop.f32.mrf.mxu1  ;;  %v594_v53 = vpop.f32.mrf.mxu0 }
 0x1ca   :  { %v2657_v54 = vpop.f32.mrf.mxu1  ;;  %v2659_v55 = vpop.f32.mrf.mxu0 }
 0x1cc   :  { %v2661_v56 = vpop.f32.mrf.mxu1  ;;  %v2663_v57 = vpop.f32.mrf.mxu0 }
 0x1ce   :  { %v634_v58 = vpop.f32.mrf.mxu1  ;;  %v675_v59 = vpop.f32.mrf.mxu0 }
 0x1d0   :  { %v635_v60 = vpop.f32.mrf.mxu1  ;;  %v676_v61 = vpop.f32.mrf.mxu0 }
 0x1da   :  { %v784_v62 = vpop.f32.mrf.mxu1 }
 0x1db   :  { %v791_v63 = vadd.f32 %v784_v62, %v384_v30 }
 0x1dc   :  { %v786_v0 = vpop.f32.mrf.mxu1 }
 0x1dd   :  { %v793_v3 = vmul.f32 0.5, %v791_v63  ;;  %v792_v4 = vadd.f32 %v786_v0, %v386_v32 }
 0x1de   :  { %v788_v5 = vpop.f32.mrf.mxu1 }
 0x1df   :  { %2310 = vtanh.f32 %v793_v3  ;;  %v794_v6 = vmul.f32 0.5, %v792_v4 }
 0x1e0   :  { %v789_v7 = vpop.f32.mrf.mxu1 }
 0x1e1   :  { %2312 = vtanh.f32 %v794_v6 }
 0x1ec   :  { %v2311_v8 = vpop.eup %2310 }
 0x1ed   :  { %v797_v9 = vmul.f32 0.5, %v2311_v8 }
 0x1ee   :  { %v2313_v11 = vpop.eup %2312 }
 0x1ef   :  { %v798_v10 = vadd.f32 0.5, %v797_v9  ;;  %v799_v30 = vmul.f32 0.5, %v2313_v11 }
 0x1f1   :  { %v802_v12 = vmul.f32 %v2313_v11, %v798_v10  ;;  %v801_v18 = vmul.f32 0.0, %v798_v10  ;;  %v800_v32 = vadd.f32 0.5, %v799_v30 }
 0x1f3   :  { %804 = vrot.lane.b32.xlu0 %v802_v12, %s2444_s23 }
 0x265   :  { %v805_v19 = vpop.permute.xlu0 %804 }
 0x266   :  { %v2686_v20 = vadd.f32 %v805_v19, %v801_v18 }
 0x268   :  { %2314 = vtanh.f32 %v2686_v20 }
 0x275   :  { %v2315_v34 = vpop.eup %2314 }
 0x276   :  { %v809_v35 = vmul.f32 %v2315_v34, %v800_v32 }
 0x278   :  { %811 = vrot.lane.b32.xlu1 %v809_v35, %s2444_s23  ;;  %v927_v36 = vpack.c.bf16 %v809_v35, %v809_v35 }
 0x27c   :  { %929 = vrot.lane.b32.xlu1 %v927_v36, %s2444_s23 }
 0x2ea   :  { %v812_v37 = vpop.permute.xlu1 %811 }
 0x2eb   :  { %v814_v42 = vsel %vm746_vm2, %v812_v37, 0.0 }
 0x2ec   :  { %v815_v43 = vpack.c.bf16 %v814_v42, %v814_v42 }
 0x2ee   :  { %2164 = vmatmul.mubr.msk.bf16.vlgmr.msra.gmra.mxu0 %vm852_vm3, %v815_v43  ;;  %v930_v44 = vpop.permute.xlu1 %929 }
 0x2ef   :  { %2069 = vmatmul.mubr.msk.bf16.vlgmr.msra.gmra.mxu1 %vm746_vm2, %v930_v44  ;;  %2168 = vmatpush3.bf16.msra.mxu0 %v2666_v13 }
 0x2f0   :  { %1094 = vmatpush1.bf16.msra.mxu1 %v2578_v23  ;;  %1117 = vmatprep.mubr.bf16.mxu1 %v2449_v2 }
 0x2f1   :  { %1095 = vmatprep.subr.bf16.mxu1 %v2584_v24  ;;  %2169 = vmatprep.subr.bf16.mxu0 %v2447_v1 }
 0x2f2   :  { %2179 = vmatprep.mubr.msk.bf16.mxu0 %vm2448_vm0, %v2447_v1 }
 0x2f3   :  { %2170 = vmatpush3.bf16.msra.mxu0 %v2669_v14 }
 0x2f4   :  { %1096 = vmatpush1.bf16.msra.mxu1 %v2595_v25  ;;  %2171 = vmatprep.subr.bf16.mxu0 %v2447_v1 }
 0x2f5   :  { %1097 = vmatprep.subr.bf16.mxu1 %v2602_v26 }
 0x2f7   :  { %2172 = vmatpush3.bf16.msra.mxu0 %v2673_v15 }
 0x2f8   :  { %1098 = vmatpush1.bf16.msra.mxu1 %v2610_v27  ;;  %2173 = vmatprep.subr.bf16.mxu0 %v2447_v1 }
 0x2f9   :  { %1099 = vmatprep.subr.bf16.mxu1 %v2616_v28 }
 0x2fb   :  { %2174 = vmatpush3.bf16.msra.mxu0 %v2677_v16 }
 0x2fc   :  { %1100 = vmatpush1.bf16.msra.mxu1 %v2622_v29  ;;  %2175 = vmatprep.subr.bf16.mxu0 %v2447_v1 }
 0x2fd   :  { %2183 = vmatprep.subr.bf16.mxu1 %v2447_v1 }
 0x2ff   :  { %2176 = vmatpush3.bf16.msra.mxu0 %v2681_v17 }
 0x300   :  { %2177 = vmatprep.subr.bf16.mxu0 %v2447_v1 }
 0x303   :  { %2178 = vmatpush3.bf16.msra.mxu0 %v2689_v21 }
 0x304   :  { %1244 = vmatprep.subr.bf16.mxu0 %v2571_v22 }
 0x3ae   :  { %v890_v50 = vpop.f32.mrf.mxu0 }
 0x3af   :  { %v891_v51 = vadd.f32 %v2724_v45, %v890_v50  ;;  %v968_v52 = vpop.f32.mrf.mxu1 }
 0x3b0   :  { %v975_v53 = vadd.f32 %v968_v52, %v2637_v31  ;;  %v2165_v58 = vpop.f32.mrf.mxu0 }
 0x3b1   :  { %v896_v59 = vmul.f32 0.5, %v891_v51  ;;  %v970_v60 = vpop.f32.mrf.mxu1 }
 0x3b2   :  { %v977_v61 = vmul.f32 0.5, %v975_v53  ;;  %v976_v62 = vadd.f32 %v970_v60, %v2639_v33  ;;  %v893_v63 = vpop.f32.mrf.mxu0 }
 0x3b3   :  { %2316 = vtanh.f32 %v896_v59  ;;  %v972_v0 = vpop.f32.mrf.mxu1 }
 0x3b4   :  { %2318 = vtanh.f32 %v977_v61  ;;  %v978_v3 = vmul.f32 0.5, %v976_v62  ;;  %v2166_v4 = vpop.f32.mrf.mxu0 }
 0x3b5   :  { %v973_v5 = vpop.f32.mrf.mxu1 }
 0x3b6   :  { %2320 = vtanh.f32 %v978_v3 }
 0x3c0   :  { %v2317_v6 = vpop.eup %2316 }
 0x3c1   :  { %v2319_v7 = vpop.eup %2318  ;;  %902 = vrot.lane.b32.xlu0 %v2317_v6, %s2444_s23  ;;  %v898_v11 = vmul.f32 0.5, %v2317_v6 }
 0x3c2   :  { %v981_v8 = vmul.f32 0.5, %v2319_v7 }
 0x3c3   :  { %v2321_v9 = vpop.eup %2320  ;;  %v899_v33 = vadd.f32 0.5, %v898_v11 }
 0x3c4   :  { %v982_v31 = vadd.f32 0.5, %v981_v8  ;;  %v983_v34 = vmul.f32 0.5, %v2321_v9 }
 0x3c5   :  { %v900_v43 = vmul.f32 0.0, %v899_v33 }
 0x3c6   :  { %v986_v10 = vmul.f32 %v2321_v9, %v982_v31  ;;  %v985_v19 = vmul.f32 %v982_v31, %v2686_v20  ;;  %v984_v35 = vadd.f32 0.5, %v983_v34 }
 0x3c8   :  { %988 = vrot.lane.b32.xlu0 %v986_v10, %s2444_s23 }
 0x433   :  { %v903_v12 = vpop.permute.xlu0 %902 }
 0x434   :  { %v905_v18 = vmul.f32 %v903_v12, %v899_v33 }
 0x436   :  { %907 = vrot.lane.b32.xlu1 %v905_v18, %s2450_s14 }
 0x43a   :  { %v989_v30 = vpop.permute.xlu0 %988 }
 0x43b   :  { %v2733_v32 = vadd.f32 %v989_v30, %v985_v19 }
 0x43d   :  { %2322 = vtanh.f32 %v2733_v32 }
 0x44a   :  { %v2323_v36 = vpop.eup %2322 }
 0x44b   :  { %v993_v37 = vmul.f32 %v2323_v36, %v984_v35 }
 0x44d   :  { %995 = vrot.lane.b32.xlu0 %v993_v37, %s2444_s23  ;;  %v1078_v42 = vpack.c.bf16 %v993_v37, %v993_v37 }
 0x451   :  { %1080 = vrot.lane.b32.xlu0 %v1078_v42, %s2444_s23 }
 0x4a8   :  { %v908_v44 = vpop.permute.xlu1 %907 }
 0x4a9   :  { %v2738_v50 = vadd.f32 %v908_v44, %v900_v43 }
 0x4ab   :  { %2324 = vtanh.f32 %v2738_v50 }
 0x4b8   :  { %v2325_v20 = vpop.eup %2324 }
 0x4b9   :  { %913 = vrot.lane.b32.xlu1 %v2325_v20, %s2444_s23 }
 0x4bf   :  { %v996_v51 = vpop.permute.xlu0 %995 }
 0x4c3   :  { %v1081_v52 = vpop.permute.xlu0 %1080 }
 0x4c4   :  { %2071 = vmatmul.mubr.msk.bf16.vlgmr.msra.gmra.mxu1 %vm746_vm2, %v1081_v52 }
 0x4c5   :  { %2184 = vmatpush3.bf16.msra.mxu1 %v2666_v13  ;;  %2195 = vmatprep.mubr.msk.bf16.mxu1 %vm2448_vm0, %v2447_v1 }
 0x4c6   :  { %2185 = vmatprep.subr.bf16.mxu1 %v2447_v1 }
 0x4c9   :  { %2186 = vmatpush3.bf16.msra.mxu1 %v2669_v14 }
 0x4ca   :  { %2187 = vmatprep.subr.bf16.mxu1 %v2447_v1 }
 0x4cd   :  { %2188 = vmatpush3.bf16.msra.mxu1 %v2673_v15 }
 0x4ce   :  { %2189 = vmatprep.subr.bf16.mxu1 %v2447_v1 }
 0x4d1   :  { %2190 = vmatpush3.bf16.msra.mxu1 %v2677_v16 }
 0x4d2   :  { %2191 = vmatprep.subr.bf16.mxu1 %v2447_v1 }
 0x4d5   :  { %2192 = vmatpush3.bf16.msra.mxu1 %v2681_v17 }
 0x4d6   :  { %2193 = vmatprep.subr.bf16.mxu1 %v2447_v1 }
 0x4d9   :  { %2194 = vmatpush3.bf16.msra.mxu1 %v2689_v21 }
 0x4da   :  { %1395 = vmatprep.subr.bf16.mxu1 %v2571_v22 }
 0x52b   :  { %v914_v53 = vpop.permute.xlu1 %913 }
 0x52c   :  { %v2757_v58 = vmul.f32 %v914_v53, %v899_v33 }
 0x52e   :  { %999 = vrot.lane.b32.xlu1 %v2757_v58, %s2451_s15 }
 0x584   :  { %v1119_v59 = vpop.f32.mrf.mxu1 }
 0x585   :  { %v1126_v60 = vadd.f32 %v1119_v59, %v2641_v38 }
 0x586   :  { %v1121_v61 = vpop.f32.mrf.mxu1 }
 0x587   :  { %v1128_v62 = vmul.f32 0.5, %v1126_v60  ;;  %v1127_v63 = vadd.f32 %v1121_v61, %v2645_v40 }
 0x588   :  { %v1123_v0 = vpop.f32.mrf.mxu1 }
 0x589   :  { %2326 = vtanh.f32 %v1128_v62  ;;  %v1129_v3 = vmul.f32 0.5, %v1127_v63 }
 0x58a   :  { %v1124_v4 = vpop.f32.mrf.mxu1 }
 0x58b   :  { %2328 = vtanh.f32 %v1129_v3 }
 0x596   :  { %v2327_v5 = vpop.eup %2326 }
 0x597   :  { %v1132_v6 = vmul.f32 0.5, %v2327_v5 }
 0x598   :  { %v2329_v8 = vpop.eup %2328 }
 0x599   :  { %v1133_v7 = vadd.f32 0.5, %v1132_v6  ;;  %v1134_v20 = vmul.f32 0.5, %v2329_v8 }
 0x59b   :  { %v1137_v31 = vmul.f32 %v2329_v8, %v1133_v7  ;;  %v1136_v42 = vmul.f32 %v1133_v7, %v2733_v32 }
 0x5a0   :  { %v1000_v9 = vpop.permute.xlu1 %999 }
 0x5a1   :  { %v1002_v10 = vsel %vm746_vm2, %v996_v51, %v1000_v9  ;;  %v1135_v51 = vadd.f32 0.5, %v1134_v20 }
 0x5a2   :  { %v1003_v11 = vpack.c.bf16 %v1002_v10, %v1002_v10 }
 0x5a4   :  { %2180 = vmatmul.mubr.msk.bf16.vlgmr.msra.gmra.mxu0 %vm852_vm3, %v1003_v11 }
 0x5a5   :  { %1245 = vmatpush1.bf16.msra.mxu0 %v2578_v23  ;;  %1268 = vmatprep.mubr.bf16.mxu0 %v2449_v2 }
 0x5a6   :  { %1246 = vmatprep.subr.bf16.mxu0 %v2584_v24 }
 0x5a9   :  { %1247 = vmatpush1.bf16.msra.mxu0 %v2595_v25 }
 0x5aa   :  { %1248 = vmatprep.subr.bf16.mxu0 %v2602_v26 }
 0x5ad   :  { %1249 = vmatpush1.bf16.msra.mxu0 %v2610_v27 }
 0x5ae   :  { %1250 = vmatprep.subr.bf16.mxu0 %v2616_v28 }
 0x5b1   :  { %1251 = vmatpush1.bf16.msra.mxu0 %v2622_v29 }
 0x5b2   :  { %2199 = vmatprep.subr.bf16.mxu0 %v2447_v1 }
 0x664   :  { %v1041_v38 = vpop.f32.mrf.mxu0 }
 0x665   :  { %v1042_v40 = vadd.f32 %v2724_v45, %v1041_v38 }
 0x666   :  { %v2181_v33 = vpop.f32.mrf.mxu0 }
 0x667   :  { %v1047_v12 = vmul.f32 0.5, %v1042_v40 }
 0x668   :  { %v1044_v18 = vpop.f32.mrf.mxu0 }
 0x669   :  { %2330 = vtanh.f32 %v1047_v12 }
 0x66a   :  { %v2182_v19 = vpop.f32.mrf.mxu0 }
 0x676   :  { %v2331_v30 = vpop.eup %2330 }
 0x677   :  { %1053 = vrot.lane.b32.xlu1 %v2331_v30, %s2444_s23  ;;  %v1049_v34 = vmul.f32 0.5, %v2331_v30 }
 0x679   :  { %v1050_v35 = vadd.f32 0.5, %v1049_v34 }
 0x67b   :  { %1139 = vrot.lane.b32.xlu1 %v1137_v31, %s2444_s23  ;;  %v1051_v60 = vmul.f32 %v1050_v35, %v2738_v50 }
 0x6e9   :  { %v1054_v36 = vpop.permute.xlu1 %1053 }
 0x6ea   :  { %v1056_v37 = vmul.f32 %v1054_v36, %v1050_v35 }
 0x6ec   :  { %1058 = vrot.lane.b32.xlu0 %v1056_v37, %s2450_s14 }
 0x6ed   :  { %v1140_v43 = vpop.permute.xlu1 %1139 }
 0x6ee   :  { %v2779_v44 = vadd.f32 %v1140_v43, %v1136_v42 }
 0x6f0   :  { %2332 = vtanh.f32 %v2779_v44 }
 0x6fd   :  { %v2333_v52 = vpop.eup %2332 }
 0x6fe   :  { %v1144_v53 = vmul.f32 %v2333_v52, %v1135_v51 }
 0x700   :  { %1146 = vrot.lane.b32.xlu1 %v1144_v53, %s2444_s23  ;;  %v1229_v59 = vpack.c.bf16 %v1144_v53, %v1144_v53 }
 0x704   :  { %1231 = vrot.lane.b32.xlu1 %v1229_v59, %s2444_s23 }
 0x75e   :  { %v1059_v61 = vpop.permute.xlu0 %1058 }
 0x75f   :  { %v2785_v62 = vadd.f32 %v1059_v61, %v1051_v60 }
 0x761   :  { %2334 = vtanh.f32 %v2785_v62 }
 0x76e   :  { %v2335_v32 = vpop.eup %2334 }
 0x76f   :  { %1064 = vrot.lane.b32.xlu0 %v2335_v32, %s2444_s23 }
 0x772   :  { %v1147_v63 = vpop.permute.xlu1 %1146 }
 0x776   :  { %v1232_v0 = vpop.permute.xlu1 %1231 }
 0x777   :  { %2073 = vmatmul.mubr.msk.bf16.vlgmr.msra.gmra.mxu0 %vm746_vm2, %v1232_v0 }
 0x778   :  { %2200 = vmatpush3.bf16.msra.mxu0 %v2666_v13  ;;  %2211 = vmatprep.mubr.msk.bf16.mxu0 %vm2448_vm0, %v2447_v1 }
 0x779   :  { %2201 = vmatprep.subr.bf16.mxu0 %v2447_v1 }
 0x77c   :  { %2202 = vmatpush3.bf16.msra.mxu0 %v2669_v14 }
 0x77d   :  { %2203 = vmatprep.subr.bf16.mxu0 %v2447_v1 }
 0x780   :  { %2204 = vmatpush3.bf16.msra.mxu0 %v2673_v15 }
 0x781   :  { %2205 = vmatprep.subr.bf16.mxu0 %v2447_v1 }
 0x784   :  { %2206 = vmatpush3.bf16.msra.mxu0 %v2677_v16 }
 0x785   :  { %2207 = vmatprep.subr.bf16.mxu0 %v2447_v1 }
 0x788   :  { %2208 = vmatpush3.bf16.msra.mxu0 %v2681_v17 }
 0x789   :  { %2209 = vmatprep.subr.bf16.mxu0 %v2447_v1 }
 0x78c   :  { %2210 = vmatpush3.bf16.msra.mxu0 %v2689_v21 }
 0x78d   :  { %1546 = vmatprep.subr.bf16.mxu0 %v2571_v22 }
 0x7e1   :  { %v1065_v50 = vpop.permute.xlu0 %1064 }
 0x7e2   :  { %v2804_v3 = vmul.f32 %v1065_v50, %v1050_v35 }
 0x7e4   :  { %1150 = vrot.lane.b32.xlu0 %v2804_v3, %s2451_s15 }
 0x837   :  { %v1270_v4 = vpop.f32.mrf.mxu0 }
 0x838   :  { %v1277_v5 = vadd.f32 %v1270_v4, %v2643_v39 }
 0x839   :  { %v1272_v6 = vpop.f32.mrf.mxu0 }
 0x83a   :  { %v1279_v7 = vmul.f32 0.5, %v1277_v5  ;;  %v1278_v8 = vadd.f32 %v1272_v6, %v2647_v41 }
 0x83b   :  { %v1274_v31 = vpop.f32.mrf.mxu0 }
 0x83c   :  { %2336 = vtanh.f32 %v1279_v7  ;;  %v1280_v9 = vmul.f32 0.5, %v1278_v8 }
 0x83d   :  { %v1275_v10 = vpop.f32.mrf.mxu0 }
 0x83e   :  { %2338 = vtanh.f32 %v1280_v9 }
 0x849   :  { %v2337_v11 = vpop.eup %2336 }
 0x84a   :  { %v1283_v38 = vmul.f32 0.5, %v2337_v11 }
 0x84b   :  { %v2339_v33 = vpop.eup %2338 }
 0x84c   :  { %v1284_v40 = vadd.f32 0.5, %v1283_v38  ;;  %v1285_v61 = vmul.f32 0.5, %v2339_v33 }
 0x84e   :  { %v1288_v12 = vmul.f32 %v2339_v33, %v1284_v40  ;;  %v1287_v53 = vmul.f32 %v1284_v40, %v2779_v44  ;;  %v1286_v32 = vadd.f32 0.5, %v1285_v61 }
 0x856   :  { %v1151_v18 = vpop.permute.xlu0 %1150 }
 0x857   :  { %v1153_v19 = vsel %vm746_vm2, %v1147_v63, %v1151_v18 }
 0x858   :  { %v1154_v30 = vpack.c.bf16 %v1153_v19, %v1153_v19 }
 0x85a   :  { %2196 = vmatmul.mubr.msk.bf16.vlgmr.msra.gmra.mxu1 %vm852_vm3, %v1154_v30 }
 0x85b   :  { %1396 = vmatpush1.bf16.msra.mxu1 %v2578_v23  ;;  %1419 = vmatprep.mubr.bf16.mxu1 %v2449_v2 }
 0x85c   :  { %1397 = vmatprep.subr.bf16.mxu1 %v2584_v24 }
 0x85f   :  { %1398 = vmatpush1.bf16.msra.mxu1 %v2595_v25 }
 0x860   :  { %1399 = vmatprep.subr.bf16.mxu1 %v2602_v26 }
 0x863   :  { %1400 = vmatpush1.bf16.msra.mxu1 %v2610_v27 }
 0x864   :  { %1401 = vmatprep.subr.bf16.mxu1 %v2616_v28 }
 0x867   :  { %1402 = vmatpush1.bf16.msra.mxu1 %v2622_v29 }
 0x868   :  { %2215 = vmatprep.subr.bf16.mxu1 %v2447_v1 }
 0x91a   :  { %v1192_v39 = vpop.f32.mrf.mxu1 }
 0x91b   :  { %v1193_v41 = vadd.f32 %v2724_v45, %v1192_v39 }
 0x91c   :  { %v2197_v34 = vpop.f32.mrf.mxu1 }
 0x91d   :  { %v1198_v35 = vmul.f32 0.5, %v1193_v41 }
 0x91e   :  { %v1195_v36 = vpop.f32.mrf.mxu1 }
 0x91f   :  { %2340 = vtanh.f32 %v1198_v35 }
 0x920   :  { %v2198_v37 = vpop.f32.mrf.mxu1 }
 0x92c   :  { %v2341_v42 = vpop.eup %2340 }
 0x92d   :  { %1204 = vrot.lane.b32.xlu0 %v2341_v42, %s2444_s23  ;;  %v1200_v43 = vmul.f32 0.5, %v2341_v42 }
 0x92f   :  { %v1201_v20 = vadd.f32 0.5, %v1200_v43 }
 0x931   :  { %1290 = vrot.lane.b32.xlu0 %v1288_v12, %s2444_s23  ;;  %v1202_v4 = vmul.f32 %v1201_v20, %v2785_v62 }
 0x99f   :  { %v1205_v51 = vpop.permute.xlu0 %1204 }
 0x9a0   :  { %v1207_v52 = vmul.f32 %v1205_v51, %v1201_v20 }
 0x9a2   :  { %1209 = vrot.lane.b32.xlu1 %v1207_v52, %s2450_s14 }
 0x9a3   :  { %v1291_v59 = vpop.permute.xlu0 %1290 }
 0x9a4   :  { %v2826_v60 = vadd.f32 %v1291_v59, %v1287_v53 }
 0x9a6   :  { %2342 = vtanh.f32 %v2826_v60 }
 0x9b3   :  { %v2343_v63 = vpop.eup %2342 }
 0x9b4   :  { %v1295_v0 = vmul.f32 %v2343_v63, %v1286_v32 }
 0x9b6   :  { %1297 = vrot.lane.b32.xlu0 %v1295_v0, %s2444_s23  ;;  %v1380_v50 = vpack.c.bf16 %v1295_v0, %v1295_v0 }
 0x9ba   :  { %1382 = vrot.lane.b32.xlu0 %v1380_v50, %s2444_s23 }
 0xa14   :  { %v1210_v5 = vpop.permute.xlu1 %1209 }
 0xa15   :  { %v2832_v6 = vadd.f32 %v1210_v5, %v1202_v4 }
 0xa17   :  { %2344 = vtanh.f32 %v2832_v6 }
 0xa24   :  { %v2345_v44 = vpop.eup %2344 }
 0xa25   :  { %1215 = vrot.lane.b32.xlu1 %v2345_v44, %s2444_s23 }
 0xa28   :  { %v1298_v7 = vpop.permute.xlu0 %1297 }
 0xa2c   :  { %v1383_v8 = vpop.permute.xlu0 %1382 }
 0xa2d   :  { %2075 = vmatmul.mubr.msk.bf16.vlgmr.msra.gmra.mxu1 %vm746_vm2, %v1383_v8 }
 0xa2e   :  { %2216 = vmatpush3.bf16.msra.mxu1 %v2666_v13  ;;  %2227 = vmatprep.mubr.msk.bf16.mxu1 %vm2448_vm0, %v2447_v1 }
 0xa2f   :  { %2217 = vmatprep.subr.bf16.mxu1 %v2447_v1 }
 0xa32   :  { %2218 = vmatpush3.bf16.msra.mxu1 %v2669_v14 }
 0xa33   :  { %2219 = vmatprep.subr.bf16.mxu1 %v2447_v1 }
 0xa36   :  { %2220 = vmatpush3.bf16.msra.mxu1 %v2673_v15 }
 0xa37   :  { %2221 = vmatprep.subr.bf16.mxu1 %v2447_v1 }
 0xa3a   :  { %2222 = vmatpush3.bf16.msra.mxu1 %v2677_v16 }
 0xa3b   :  { %2223 = vmatprep.subr.bf16.mxu1 %v2447_v1 }
 0xa3e   :  { %2224 = vmatpush3.bf16.msra.mxu1 %v2681_v17 }
 0xa3f   :  { %2225 = vmatprep.subr.bf16.mxu1 %v2447_v1 }
 0xa42   :  { %2226 = vmatpush3.bf16.msra.mxu1 %v2689_v21 }
 0xa43   :  { %1697 = vmatprep.subr.bf16.mxu1 %v2571_v22 }
 0xa97   :  { %v1216_v62 = vpop.permute.xlu1 %1215 }
 0xa98   :  { %v2851_v31 = vmul.f32 %v1216_v62, %v1201_v20 }
 0xa9a   :  { %1301 = vrot.lane.b32.xlu1 %v2851_v31, %s2451_s15 }
 0xaed   :  { %v1421_v9 = vpop.f32.mrf.mxu1 }
 0xaee   :  { %v1428_v10 = vadd.f32 %v1421_v9, %v2649_v46 }
 0xaef   :  { %v1423_v11 = vpop.f32.mrf.mxu1 }
 0xaf0   :  { %v1430_v38 = vmul.f32 0.5, %v1428_v10  ;;  %v1429_v40 = vadd.f32 %v1423_v11, %v2653_v48 }
 0xaf1   :  { %v1425_v33 = vpop.f32.mrf.mxu1 }
 0xaf2   :  { %2346 = vtanh.f32 %v1430_v38  ;;  %v1431_v12 = vmul.f32 0.5, %v1429_v40 }
 0xaf3   :  { %v1426_v18 = vpop.f32.mrf.mxu1 }
 0xaf4   :  { %2348 = vtanh.f32 %v1431_v12 }
 0xaff   :  { %v2347_v19 = vpop.eup %2346 }
 0xb00   :  { %v1434_v30 = vmul.f32 0.5, %v2347_v19 }
 0xb01   :  { %v2349_v41 = vpop.eup %2348 }
 0xb02   :  { %v1435_v39 = vadd.f32 0.5, %v1434_v30  ;;  %v1436_v4 = vmul.f32 0.5, %v2349_v41 }
 0xb04   :  { %v1439_v34 = vmul.f32 %v2349_v41, %v1435_v39  ;;  %v1438_v63 = vmul.f32 %v1435_v39, %v2826_v60  ;;  %v1437_v5 = vadd.f32 0.5, %v1436_v4 }
 0xb0c   :  { %v1302_v35 = vpop.permute.xlu1 %1301 }
 0xb0d   :  { %v1304_v36 = vsel %vm746_vm2, %v1298_v7, %v1302_v35 }
 0xb0e   :  { %v1305_v37 = vpack.c.bf16 %v1304_v36, %v1304_v36 }
 0xb10   :  { %2212 = vmatmul.mubr.msk.bf16.vlgmr.msra.gmra.mxu0 %vm852_vm3, %v1305_v37 }
 0xb11   :  { %1547 = vmatpush1.bf16.msra.mxu0 %v2578_v23  ;;  %1570 = vmatprep.mubr.bf16.mxu0 %v2449_v2 }
 0xb12   :  { %1548 = vmatprep.subr.bf16.mxu0 %v2584_v24 }
 0xb15   :  { %1549 = vmatpush1.bf16.msra.mxu0 %v2595_v25 }
 0xb16   :  { %1550 = vmatprep.subr.bf16.mxu0 %v2602_v26 }
 0xb19   :  { %1551 = vmatpush1.bf16.msra.mxu0 %v2610_v27 }
 0xb1a   :  { %1552 = vmatprep.subr.bf16.mxu0 %v2616_v28 }
 0xb1d   :  { %1553 = vmatpush1.bf16.msra.mxu0 %v2622_v29 }
 0xb1e   :  { %2231 = vmatprep.subr.bf16.mxu0 %v2447_v1 }
 0xbd0   :  { %v1343_v46 = vpop.f32.mrf.mxu0 }
 0xbd1   :  { %v1344_v48 = vadd.f32 %v2724_v45, %v1343_v46 }
 0xbd2   :  { %v2213_v42 = vpop.f32.mrf.mxu0 }
 0xbd3   :  { %v1349_v43 = vmul.f32 0.5, %v1344_v48 }
 0xbd4   :  { %v1346_v20 = vpop.f32.mrf.mxu0 }
 0xbd5   :  { %2350 = vtanh.f32 %v1349_v43 }
 0xbd6   :  { %v2214_v51 = vpop.f32.mrf.mxu0 }
 0xbe2   :  { %v2351_v52 = vpop.eup %2350 }
 0xbe3   :  { %1355 = vrot.lane.b32.xlu1 %v2351_v52, %s2444_s23  ;;  %v1351_v53 = vmul.f32 0.5, %v2351_v52 }
 0xbe5   :  { %v1352_v59 = vadd.f32 0.5, %v1351_v53 }
 0xbe7   :  { %1441 = vrot.lane.b32.xlu1 %v1439_v34, %s2444_s23  ;;  %v1353_v62 = vmul.f32 %v1352_v59, %v2832_v6 }
 0xc55   :  { %v1356_v61 = vpop.permute.xlu1 %1355 }
 0xc56   :  { %v1358_v32 = vmul.f32 %v1356_v61, %v1352_v59 }
 0xc58   :  { %1360 = vrot.lane.b32.xlu0 %v1358_v32, %s2450_s14 }
 0xc59   :  { %v1442_v0 = vpop.permute.xlu1 %1441 }
 0xc5a   :  { %v2873_v50 = vadd.f32 %v1442_v0, %v1438_v63 }
 0xc5c   :  { %2352 = vtanh.f32 %v2873_v50 }
 0xc69   :  { %v2353_v44 = vpop.eup %2352 }
 0xc6a   :  { %v1446_v7 = vmul.f32 %v2353_v44, %v1437_v5 }
 0xc6c   :  { %1448 = vrot.lane.b32.xlu1 %v1446_v7, %s2444_s23  ;;  %v1531_v8 = vpack.c.bf16 %v1446_v7, %v1446_v7 }
 0xc70   :  { %1533 = vrot.lane.b32.xlu1 %v1531_v8, %s2444_s23 }
 0xcca   :  { %v1361_v9 = vpop.permute.xlu0 %1360 }
 0xccb   :  { %v2879_v10 = vadd.f32 %v1361_v9, %v1353_v62 }
 0xccd   :  { %2354 = vtanh.f32 %v2879_v10 }
 0xcda   :  { %v2355_v60 = vpop.eup %2354 }
 0xcdb   :  { %1366 = vrot.lane.b32.xlu0 %v2355_v60, %s2444_s23 }
 0xcde   :  { %v1449_v11 = vpop.permute.xlu1 %1448 }
 0xce2   :  { %v1534_v38 = vpop.permute.xlu1 %1533 }
 0xce3   :  { %2077 = vmatmul.mubr.msk.bf16.vlgmr.msra.gmra.mxu0 %vm746_vm2, %v1534_v38 }
 0xce4   :  { %2232 = vmatpush3.bf16.msra.mxu0 %v2666_v13  ;;  %2243 = vmatprep.mubr.msk.bf16.mxu0 %vm2448_vm0, %v2447_v1 }
 0xce5   :  { %2233 = vmatprep.subr.bf16.mxu0 %v2447_v1 }
 0xce8   :  { %2234 = vmatpush3.bf16.msra.mxu0 %v2669_v14 }
 0xce9   :  { %2235 = vmatprep.subr.bf16.mxu0 %v2447_v1 }
 0xcec   :  { %2236 = vmatpush3.bf16.msra.mxu0 %v2673_v15 }
 0xced   :  { %2237 = vmatprep.subr.bf16.mxu0 %v2447_v1 }
 0xcf0   :  { %2238 = vmatpush3.bf16.msra.mxu0 %v2677_v16 }
 0xcf1   :  { %2239 = vmatprep.subr.bf16.mxu0 %v2447_v1 }
 0xcf4   :  { %2240 = vmatpush3.bf16.msra.mxu0 %v2681_v17 }
 0xcf5   :  { %2241 = vmatprep.subr.bf16.mxu0 %v2447_v1 }
 0xcf8   :  { %2242 = vmatpush3.bf16.msra.mxu0 %v2689_v21 }
 0xcf9   :  { %1848 = vmatprep.subr.bf16.mxu0 %v2571_v22 }
 0xd4d   :  { %v1367_v6 = vpop.permute.xlu0 %1366 }
 0xd4e   :  { %v2898_v40 = vmul.f32 %v1367_v6, %v1352_v59 }
 0xd50   :  { %1452 = vrot.lane.b32.xlu0 %v2898_v40, %s2451_s15 }
 0xda3   :  { %v1572_v33 = vpop.f32.mrf.mxu0 }
 0xda4   :  { %v1579_v12 = vadd.f32 %v1572_v33, %v2651_v47 }
 0xda5   :  { %v1574_v18 = vpop.f32.mrf.mxu0 }
 0xda6   :  { %v1581_v19 = vmul.f32 0.5, %v1579_v12  ;;  %v1580_v30 = vadd.f32 %v1574_v18, %v2655_v49 }
 0xda7   :  { %v1576_v39 = vpop.f32.mrf.mxu0 }
 0xda8   :  { %2356 = vtanh.f32 %v1581_v19  ;;  %v1582_v41 = vmul.f32 0.5, %v1580_v30 }
 0xda9   :  { %v1577_v34 = vpop.f32.mrf.mxu0 }
 0xdaa   :  { %2358 = vtanh.f32 %v1582_v41 }
 0xdb5   :  { %v2357_v35 = vpop.eup %2356 }
 0xdb6   :  { %v1585_v22 = vmul.f32 0.5, %v2357_v35 }
 0xdb7   :  { %v2359_v37 = vpop.eup %2358 }
 0xdb8   :  { %v1586_v36 = vadd.f32 0.5, %v1585_v22  ;;  %v1587_v61 = vmul.f32 0.5, %v2359_v37 }
 0xdba   :  { %v1590_v46 = vmul.f32 %v2359_v37, %v1586_v36  ;;  %v1588_v32 = vadd.f32 0.5, %v1587_v61 }
 0xdc2   :  { %v1453_v48 = vpop.permute.xlu0 %1452 }
 0xdc3   :  { %v1455_v42 = vsel %vm746_vm2, %v1449_v11, %v1453_v48  ;;  %v2393_v48 = vld [vmem:[%s3060_s6 + $0x14] ss:$8 sps:$4 sm:$0xff]  }
 0xdc4   :  { %v1456_v43 = vpack.c.bf16 %v1455_v42, %v1455_v42  ;;  %v2394_v42 = vld [vmem:[%s3060_s6 + $0x10] ss:$8 sps:$4 sm:$0xff]  }
 0xdc6   :  { %2228 = vmatmul.mubr.msk.bf16.vlgmr.msra.gmra.mxu1 %vm852_vm3, %v1456_v43  ;;  %v2396_v43 = vld [vmem:[%s3060_s6] ss:$8 sps:$4 sm:$0xff]  }
 0xdc7   :  { %1698 = vmatpush1.bf16.msra.mxu1 %v2578_v23  ;;  %1721 = vmatprep.mubr.bf16.mxu1 %v2449_v2 }
 0xdc8   :  { %1699 = vmatprep.subr.bf16.mxu1 %v2584_v24 }
 0xdcb   :  { %1700 = vmatpush1.bf16.msra.mxu1 %v2595_v25 }
 0xdcc   :  { %1701 = vmatprep.subr.bf16.mxu1 %v2602_v26 }
 0xdcf   :  { %1702 = vmatpush1.bf16.msra.mxu1 %v2610_v27 }
 0xdd0   :  { %1703 = vmatprep.subr.bf16.mxu1 %v2616_v28 }
 0xdd3   :  { %1704 = vmatpush1.bf16.msra.mxu1 %v2622_v29  ;;  %v1589_v29 = vmul.f32 %v1586_v36, %v2873_v50 }
 0xdd4   :  { %2247 = vmatprep.subr.bf16.mxu1 %v2447_v1 }
 0xe86   :  { %v1494_v47 = vpop.f32.mrf.mxu1 }
 0xe87   :  { %v1495_v49 = vadd.f32 %v2724_v45, %v1494_v47 }
 0xe88   :  { %v2229_v23 = vpop.f32.mrf.mxu1 }
 0xe89   :  { %v1500_v20 = vmul.f32 0.5, %v1495_v49 }
 0xe8a   :  { %v1497_v51 = vpop.f32.mrf.mxu1 }
 0xe8b   :  { %2360 = vtanh.f32 %v1500_v20 }
 0xe8c   :  { %v2230_v24 = vpop.f32.mrf.mxu1 }
 0xe98   :  { %v2361_v52 = vpop.eup %2360 }
 0xe99   :  { %1506 = vrot.lane.b32.xlu0 %v2361_v52, %s2444_s23  ;;  %v1502_v25 = vmul.f32 0.5, %v2361_v52 }
 0xe9b   :  { %v1503_v26 = vadd.f32 0.5, %v1502_v25 }
 0xe9d   :  { %1592 = vrot.lane.b32.xlu0 %v1590_v46, %s2444_s23  ;;  %v1504_v5 = vmul.f32 %v1503_v26, %v2879_v10  ;;  %v2392_v46 = vld [vmem:[%s3060_s6 + $0x20] ss:$8 sps:$4 sm:$0xff]  }
 0xf0b   :  { %v1507_v27 = vpop.permute.xlu0 %1506 }
 0xf0c   :  { %v1509_v28 = vmul.f32 %v1507_v27, %v1503_v26 }
 0xf0e   :  { %1511 = vrot.lane.b32.xlu1 %v1509_v28, %s2450_s14 }
 0xf0f   :  { %v1593_v53 = vpop.permute.xlu0 %1592 }
 0xf10   :  { %v2920_v59 = vadd.f32 %v1593_v53, %v1589_v29 }
 0xf12   :  { %2362 = vtanh.f32 %v2920_v59 }
 0xf1f   :  { %v2363_v63 = vpop.eup %2362 }
 0xf20   :  { %v1597_v0 = vmul.f32 %v2363_v63, %v1588_v32 }
 0xf22   :  { %1599 = vrot.lane.b32.xlu0 %v1597_v0, %s2444_s23  ;;  %v1682_v4 = vpack.c.bf16 %v1597_v0, %v1597_v0 }
 0xf26   :  { %1684 = vrot.lane.b32.xlu0 %v1682_v4, %s2444_s23 }
 0xf80   :  { %v1512_v44 = vpop.permute.xlu1 %1511 }
 0xf81   :  { %v2926_v7 = vadd.f32 %v1512_v44, %v1504_v5 }
 0xf83   :  { %2364 = vtanh.f32 %v2926_v7 }
 0xf90   :  { %v2365_v50 = vpop.eup %2364 }
 0xf91   :  { %1517 = vrot.lane.b32.xlu1 %v2365_v50, %s2444_s23 }
 0xf94   :  { %v1600_v8 = vpop.permute.xlu0 %1599 }
 0xf98   :  { %v1685_v62 = vpop.permute.xlu0 %1684 }
 0xf99   :  { %2079 = vmatmul.mubr.msk.bf16.vlgmr.msra.gmra.mxu1 %vm746_vm2, %v1685_v62 }
 0xf9a   :  { %2248 = vmatpush3.bf16.msra.mxu1 %v2666_v13  ;;  %2259 = vmatprep.mubr.msk.bf16.mxu1 %vm2448_vm0, %v2447_v1 }
 0xf9b   :  { %2249 = vmatprep.subr.bf16.mxu1 %v2447_v1 }
 0xf9e   :  { %2250 = vmatpush3.bf16.msra.mxu1 %v2669_v14 }
 0xf9f   :  { %2251 = vmatprep.subr.bf16.mxu1 %v2447_v1 }
 0xfa2   :  { %2252 = vmatpush3.bf16.msra.mxu1 %v2673_v15 }
 0xfa3   :  { %2253 = vmatprep.subr.bf16.mxu1 %v2447_v1 }
 0xfa6   :  { %2254 = vmatpush3.bf16.msra.mxu1 %v2677_v16 }
 0xfa7   :  { %2255 = vmatprep.subr.bf16.mxu1 %v2447_v1 }
 0xfaa   :  { %2256 = vmatpush3.bf16.msra.mxu1 %v2681_v17 }
 0xfab   :  { %2257 = vmatprep.subr.bf16.mxu1 %v2447_v1 }
 0xfae   :  { %2258 = vmatpush3.bf16.msra.mxu1 %v2689_v21 }
0x1003   :  { %v1518_v9 = vpop.permute.xlu1 %1517 }
0x1004   :  { %v2944_v10 = vmul.f32 %v1518_v9, %v1503_v26 }
0x1006   :  { %1603 = vrot.lane.b32.xlu1 %v2944_v10, %s2451_s15 }
0x1059   :  { %v1723_v60 = vpop.f32.mrf.mxu1 }
0x105a   :  { %v1730_v11 = vadd.f32 %v1723_v60, %v2657_v54  ;;  %v2390_v54 = vld [vmem:[%s3060_s6 + $0x30] ss:$8 sps:$4 sm:$0xff]  }
0x105b   :  { %v1725_v38 = vpop.f32.mrf.mxu1 }
0x105c   :  { %v1732_v6 = vmul.f32 0.5, %v1730_v11  ;;  %v1731_v33 = vadd.f32 %v1725_v38, %v2661_v56  ;;  %v2391_v56 = vld [vmem:[%s3060_s6 + $0x24] ss:$8 sps:$4 sm:$0xff]  }
0x105d   :  { %v1727_v12 = vpop.f32.mrf.mxu1 }
0x105e   :  { %2366 = vtanh.f32 %v1732_v6  ;;  %v1733_v18 = vmul.f32 0.5, %v1731_v33 }
0x105f   :  { %v1728_v19 = vpop.f32.mrf.mxu1 }
0x1060   :  { %2368 = vtanh.f32 %v1733_v18 }
0x106b   :  { %v2367_v30 = vpop.eup %2366 }
0x106c   :  { %v1736_v39 = vmul.f32 0.5, %v2367_v30 }
0x106d   :  { %v2369_v34 = vpop.eup %2368 }
0x106e   :  { %v1737_v41 = vadd.f32 0.5, %v1736_v39  ;;  %v1738_v32 = vmul.f32 0.5, %v2369_v34 }
0x1070   :  { %v1741_v35 = vmul.f32 %v2369_v34, %v1737_v41  ;;  %v1740_v29 = vmul.f32 %v1737_v41, %v2920_v59  ;;  %v1739_v63 = vadd.f32 0.5, %v1738_v32 }
0x1078   :  { %v1604_v22 = vpop.permute.xlu1 %1603 }
0x1079   :  { %v1606_v36 = vsel %vm746_vm2, %v1600_v8, %v1604_v22 }
0x107a   :  { %v1607_v37 = vpack.c.bf16 %v1606_v36, %v1606_v36 }
0x107c   :  { %2244 = vmatmul.mubr.msk.bf16.vlgmr.msra.gmra.mxu0 %vm852_vm3, %v1607_v37 }
0x107d   :  { %1849 = vmatpush1.bf16.msra.mxu0 %v2390_v54  ;;  %1872 = vmatprep.mubr.bf16.mxu0 %v2449_v2  ;;  %v2395_v2 = vld [vmem:[%s3060_s6 + $0x4] ss:$8 sps:$4 sm:$0xff]  }
0x107e   :  { %1850 = vmatprep.subr.bf16.mxu0 %v2391_v56 }
0x1081   :  { %1851 = vmatpush1.bf16.msra.mxu0 %v2392_v46 }
0x1082   :  { %1852 = vmatprep.subr.bf16.mxu0 %v2393_v48 }
0x1085   :  { %1853 = vmatpush1.bf16.msra.mxu0 %v2394_v42 }
0x1086   :  { %1854 = vmatprep.subr.bf16.mxu0 %v2395_v2 }
0x1089   :  { %1855 = vmatpush1.bf16.msra.mxu0 %v2396_v43 }
0x108a   :  { %2263 = vmatprep.subr.bf16.mxu0 %v2447_v1 }
0x113c   :  { %v1645_v47 = vpop.f32.mrf.mxu0 }
0x113d   :  { %v1646_v49 = vadd.f32 %v2724_v45, %v1645_v47 }
0x113e   :  { %v2245_v23 = vpop.f32.mrf.mxu0 }
0x113f   :  { %v1651_v20 = vmul.f32 0.5, %v1646_v49 }
0x1140   :  { %v1648_v51 = vpop.f32.mrf.mxu0 }
0x1141   :  { %2370 = vtanh.f32 %v1651_v20 }
0x1142   :  { %v2246_v24 = vpop.f32.mrf.mxu0 }
0x114e   :  { %v2371_v52 = vpop.eup %2370 }
0x114f   :  { %1657 = vrot.lane.b32.xlu1 %v2371_v52, %s2444_s23  ;;  %v1653_v25 = vmul.f32 0.5, %v2371_v52 }
0x1151   :  { %v1654_v26 = vadd.f32 0.5, %v1653_v25 }
0x1153   :  { %1743 = vrot.lane.b32.xlu1 %v1741_v35, %s2444_s23  ;;  %v1655_v44 = vmul.f32 %v1654_v26, %v2926_v7 }
0x11c1   :  { %v1658_v27 = vpop.permute.xlu1 %1657 }
0x11c2   :  { %v1660_v28 = vmul.f32 %v1658_v27, %v1654_v26 }
0x11c4   :  { %1662 = vrot.lane.b32.xlu0 %v1660_v28, %s2450_s14 }
0x11c5   :  { %v1744_v53 = vpop.permute.xlu1 %1743 }
0x11c6   :  { %v2980_v61 = vadd.f32 %v1744_v53, %v1740_v29 }
0x11c8   :  { %2372 = vtanh.f32 %v2980_v61 }
0x11d5   :  { %v2373_v0 = vpop.eup %2372 }
0x11d6   :  { %v1748_v4 = vmul.f32 %v2373_v0, %v1739_v63 }
0x11d8   :  { %1750 = vrot.lane.b32.xlu1 %v1748_v4, %s2444_s23  ;;  %v1833_v5 = vpack.c.bf16 %v1748_v4, %v1748_v4 }
0x11dc   :  { %1835 = vrot.lane.b32.xlu1 %v1833_v5, %s2444_s23 }
0x1236   :  { %v1663_v50 = vpop.permute.xlu0 %1662 }
0x1237   :  { %v2986_v8 = vadd.f32 %v1663_v50, %v1655_v44  ;;  %v917_v44 = vlaneseq }
0x1239   :  { %2374 = vtanh.f32 %v2986_v8  ;;  %v918_v50 = vshrl.u32 %v917_v44, 7 }
0x1246   :  { %v2375_v59 = vpop.eup %2374 }
0x1247   :  { %1668 = vrot.lane.b32.xlu0 %v2375_v59, %s2444_s23  ;;  %v705_v59 = vld [vmem:[%s3063_s9] sm:$0xff] }
0x124a   :  { %v1751_v62 = vpop.permute.xlu1 %1750 }
0x124e   :  { %v1836_v9 = vpop.permute.xlu1 %1835 }
0x124f   :  { %2081 = vmatmul.mubr.msk.bf16.vlgmr.msra.gmra.mxu0 %vm746_vm2, %v1836_v9 }
0x1250   :  { %2264 = vmatpush3.bf16.msra.mxu0 %v2666_v13  ;;  %2275 = vmatprep.mubr.msk.bf16.mxu0 %vm2448_vm0, %v2447_v1 }
0x1251   :  { %2265 = vmatprep.subr.bf16.mxu0 %v2447_v1 }
0x1254   :  { %2266 = vmatpush3.bf16.msra.mxu0 %v2669_v14 }
0x1255   :  { %2267 = vmatprep.subr.bf16.mxu0 %v2447_v1 }
0x1258   :  { %2268 = vmatpush3.bf16.msra.mxu0 %v2673_v15 }
0x1259   :  { %2269 = vmatprep.subr.bf16.mxu0 %v2447_v1 }
0x125c   :  { %2270 = vmatpush3.bf16.msra.mxu0 %v2677_v16 }
0x125d   :  { %2271 = vmatprep.subr.bf16.mxu0 %v2447_v1 }
0x1260   :  { %2272 = vmatpush3.bf16.msra.mxu0 %v2681_v17 }
0x1261   :  { %2273 = vmatprep.subr.bf16.mxu0 %v2447_v1 }
0x1264   :  { %2274 = vmatpush3.bf16.msra.mxu0 %v2689_v21 }
0x12b9   :  { %v1669_v13 = vpop.permute.xlu0 %1668 }
0x12ba   :  { %v3004_v7 = vmul.f32 %v1669_v13, %v1654_v26  ;;  %v1221_v13 = vsub.s32 2, %v918_v50 }
0x12bc   :  { %1754 = vrot.lane.b32.xlu0 %v3004_v7, %s2451_s15 }
0x130f   :  { %v1874_v14 = vpop.f32.mrf.mxu0 }
0x1310   :  { %v1881_v15 = vadd.f32 %v1874_v14, %v2659_v55  ;;  %v1222_v14 = vrot.slane %v705_v59, %v1221_v13 }
0x1311   :  { %v1876_v60 = vpop.f32.mrf.mxu0 }
0x1312   :  { %v1883_v11 = vmul.f32 0.5, %v1881_v15  ;;  %v1882_v16 = vadd.f32 %v1876_v60, %v2663_v57  ;;  %v1523_v15 = vsub.s32 4, %v918_v50 }
0x1313   :  { %v1878_v38 = vpop.f32.mrf.mxu0 }
0x1314   :  { %2376 = vtanh.f32 %v1883_v11  ;;  %v1884_v17 = vmul.f32 0.5, %v1882_v16  ;;  %v1524_v60 = vrot.slane %v705_v59, %v1523_v15  ;;  %v1825_v11 = vsub.s32 6, %v918_v50 }
0x1315   :  { %v1879_v6 = vpop.f32.mrf.mxu0 }
0x1316   :  { %2378 = vtanh.f32 %v1884_v17  ;;  %v1826_v16 = vrot.slane %v705_v59, %v1825_v11  ;;  %v1070_v6 = vsub.s32 1, %v918_v50 }
0x1321   :  { %v2377_v1 = vpop.eup %2376 }
0x1322   :  { %v1887_v21 = vmul.f32 0.5, %v2377_v1 }
0x1323   :  { %v2379_v12 = vpop.eup %2378 }
0x1324   :  { %v1888_v33 = vadd.f32 0.5, %v1887_v21  ;;  %v1889_v2 = vmul.f32 0.5, %v2379_v12 }
0x1326   :  { %v1892_v18 = vmul.f32 %v2379_v12, %v1888_v33  ;;  %v1891_v48 = vmul.f32 %v1888_v33, %v2980_v61  ;;  %v1890_v43 = vadd.f32 0.5, %v1889_v2  ;;  %v2397_v61 = vld [vmem:[%s3062_s8] ss:$0 sm:$0xff]  ;;  %v1071_v33 = vrot.slane %v705_v59, %v1070_v6 }
0x1327   :  { %v1372_v12 = vsub.s32 3, %v918_v50 }
0x132e   :  { %v1755_v19 = vpop.permute.xlu0 %1754 }
0x132f   :  { %v1757_v30 = vsel %vm746_vm2, %v1751_v62, %v1755_v19 }
0x1330   :  { %v1758_v39 = vpack.c.bf16 %v1757_v30, %v1757_v30  ;;  %v1373_v30 = vrot.slane %v705_v59, %v1372_v12 }
0x1332   :  { %2260 = vmatmul.mubr.msk.bf16.vlgmr.msra.gmra.mxu1 %vm852_vm3, %v1758_v39  ;;  %v1674_v39 = vsub.s32 5, %v918_v50 }
0x13f2   :  { %v1796_v55 = vpop.f32.mrf.mxu1 }
0x13f3   :  { %v1797_v41 = vadd.f32 %v2724_v45, %v1796_v55  ;;  %v1675_v55 = vrot.slane %v705_v59, %v1674_v39 }
0x13f4   :  { %v2261_v57 = vpop.f32.mrf.mxu1 }
0x13f5   :  { %v1802_v34 = vmul.f32 0.5, %v1797_v41 }
0x13f6   :  { %v1799_v35 = vpop.f32.mrf.mxu1 }
0x13f7   :  { %2380 = vtanh.f32 %v1802_v34 }
0x13f8   :  { %v2262_v22 = vpop.f32.mrf.mxu1 }
0x1404   :  { %v2381_v36 = vpop.eup %2380 }
0x1405   :  { %1808 = vrot.lane.b32.xlu0 %v2381_v36, %s2444_s23  ;;  %v1804_v37 = vmul.f32 0.5, %v2381_v36 }
0x1407   :  { %v1805_v54 = vadd.f32 0.5, %v1804_v37 }
0x1409   :  { %1894 = vrot.lane.b32.xlu0 %v1892_v18, %s2444_s23  ;;  %v1806_v23 = vmul.f32 %v1805_v54, %v2986_v8  ;;  %v919_v8 = vsub.s32 0, %v918_v50  ;;  %v1976_v18 = vsub.s32 7, %v918_v50 }
0x140b   :  { %v920_v9 = vrot.slane %v705_v59, %v919_v8  ;;  %v1977_v19 = vrot.slane %v705_v59, %v1976_v18 }
0x1477   :  { %v1809_v56 = vpop.permute.xlu0 %1808 }
0x1478   :  { %v1811_v46 = vmul.f32 %v1809_v56, %v1805_v54 }
0x147a   :  { %1813 = vrot.lane.b32.xlu1 %v1811_v46, %s2450_s14 }
0x147b   :  { %v1895_v42 = vpop.permute.xlu0 %1894 }
0x147c   :  { %v1897_v45 = vadd.f32 %v1895_v42, %v1891_v48 }
0x147e   :  { %2382 = vtanh.f32 %v1897_v45 }
0x148b   :  { %v2383_v47 = vpop.eup %2382 }
0x148c   :  { %v1899_v49 = vmul.f32 %v2383_v47, %v1890_v43 }
0x148e   :  { %1901 = vrot.lane.b32.xlu0 %v1899_v49, %s2444_s23 }
0x14ec   :  { %v1814_v20 = vpop.permute.xlu1 %1813 }
0x14ed   :  { %v1816_v51 = vadd.f32 %v1814_v20, %v1806_v23 }
0x14ef   :  { %2384 = vtanh.f32 %v1816_v51 }
0x14fc   :  { %v2385_v24 = vpop.eup %2384 }
0x14fd   :  { %1819 = vrot.lane.b32.xlu1 %v2385_v24, %s2444_s23 }
0x1500   :  { %v1902_v26 = vpop.permute.xlu0 %1901 }
0x156f   :  { %v1820_v52 = vpop.permute.xlu1 %1819 }
0x1570   :  { %v3020_v25 = vmul.f32 %v1820_v52, %v1805_v54 }
0x1572   :  { %1905 = vrot.lane.b32.xlu1 %v3020_v25, %s2451_s15 }
0x15e4   :  { %v1906_v27 = vpop.permute.xlu1 %1905 }
0x15e5   :  { %v1908_v28 = vsel %vm746_vm2, %v1902_v26, %v1906_v27 }
0x15e6   :  { %v1909_v29 = vpack.c.bf16 %v1908_v28, %v1908_v28 }
0x15e8   :  { %2276 = vmatmul.mubr.msk.bf16.vlgmr.msra.gmra.mxu0 %vm852_vm3, %v1909_v29 }
0x16a8   :  { %v1947_v53 = vpop.f32.mrf.mxu0 }
0x16a9   :  { %v1948_v32 = vadd.f32 %v2397_v61, %v1947_v53 }
0x16aa   :  { %v2277_v63 = vpop.f32.mrf.mxu0 }
0x16ab   :  { %v1953_v0 = vmul.f32 0.5, %v1948_v32 }
0x16ac   :  { %v1950_v4 = vpop.f32.mrf.mxu0 }
0x16ad   :  { %2386 = vtanh.f32 %v1953_v0 }
0x16ae   :  { %v2278_v5 = vpop.f32.mrf.mxu0 }
0x16ba   :  { %v2387_v62 = vpop.eup %2386 }
0x16bb   :  { %1959 = vrot.lane.b32.xlu0 %v2387_v62, %s2444_s23  ;;  %v1955_v38 = vmul.f32 0.5, %v2387_v62 }
0x16bd   :  { %v1956_v17 = vadd.f32 0.5, %v1955_v38 }
0x16bf   :  { %922 = vrot.lane.b32.xlu0 %v920_v9, %s2451_s15  ;;  %v1957_v41 = vmul.f32 %v1956_v17, %v1816_v51 }
0x16c3   :  { %1224 = vrot.lane.b32.xlu0 %v1222_v14, %s2451_s15 }
0x16c7   :  { %1526 = vrot.lane.b32.xlu0 %v1524_v60, %s2451_s15 }
0x16cb   :  { %1828 = vrot.lane.b32.xlu0 %v1826_v16, %s2451_s15 }
0x16cf   :  { %1979 = vrot.lane.b32.xlu0 %v1977_v19, %s2451_s15 }
0x172d   :  { %v1960_v1 = vpop.permute.xlu0 %1959 }
0x172e   :  { %v1962_v21 = vmul.f32 %v1960_v1, %v1956_v17 }
0x1730   :  { %1964 = vrot.lane.b32.xlu1 %v1962_v21, %s2450_s14 }
0x1731   :  { %v923_v22 = vpop.permute.xlu0 %922 }
0x1732   :  { %v925_v54 = vmul.f32 %v923_v22, %v2757_v58 }
0x1734   :  { %1073 = vrot.lane.b32.xlu1 %v1071_v33, %s2451_s15 }
0x1735   :  { %v1225_v56 = vpop.permute.xlu0 %1224 }
0x1736   :  { %v1227_v42 = vmul.f32 %v1225_v56, %v2851_v31 }
0x1738   :  { %1375 = vrot.lane.b32.xlu1 %v1373_v30, %s2451_s15 }
0x1739   :  { %v1527_v43 = vpop.permute.xlu0 %1526 }
0x173a   :  { %v1529_v23 = vmul.f32 %v1527_v43, %v2944_v10  ;;  %v2083_v10 = vld [vmem:[#allocation2] ss:$0 sm:$0xff] }
0x173c   :  { %1677 = vrot.lane.b32.xlu1 %v1675_v55, %s2451_s15 }
0x173d   :  { %v1829_v24 = vpop.permute.xlu0 %1828 }
0x173e   :  { %v1831_v26 = vmul.f32 %v1829_v24, %v3020_v25 }
0x1741   :  { %v1980_v58 = vpop.permute.xlu0 %1979 }
0x17a2   :  { %v1965_v57 = vpop.permute.xlu1 %1964 }
0x17a3   :  { %v1967_v34 = vadd.f32 %v1965_v57, %v1957_v41 }
0x17a5   :  { %2388 = vtanh.f32 %v1967_v34 }
0x17a6   :  { %v1074_v36 = vpop.permute.xlu1 %1073 }
0x17a7   :  { %v1076_v37 = vmul.f32 %v1074_v36, %v2804_v3 }
0x17a9   :  { %v1077_v46 = vadd.f32 %v1076_v37, %v925_v54 }
0x17aa   :  { %v1376_v48 = vpop.permute.xlu1 %1375 }
0x17ab   :  { %v1228_v45 = vadd.f32 %v1227_v42, %v1077_v46  ;;  %v1378_v2 = vmul.f32 %v1376_v48, %v2898_v40 }
0x17ad   :  { %v1379_v47 = vadd.f32 %v1378_v2, %v1228_v45 }
0x17ae   :  { %v1678_v49 = vpop.permute.xlu1 %1677 }
0x17af   :  { %v1530_v20 = vadd.f32 %v1529_v23, %v1379_v47  ;;  %v1680_v51 = vmul.f32 %v1678_v49, %v3004_v7 }
0x17b1   :  { %v1681_v3 = vadd.f32 %v1680_v51, %v1530_v20 }
0x17b2   :  { %v2389_v35 = vpop.eup %2388 }
0x17b3   :  { %1970 = vrot.lane.b32.xlu1 %v2389_v35, %s2444_s23  ;;  %v1832_v28 = vadd.f32 %v1831_v26, %v1681_v3 }
0x1825   :  { %v1971_v52 = vpop.permute.xlu1 %1970 }
0x1826   :  { %v1973_v27 = vmul.f32 %v1971_v52, %v1956_v17 }
0x1828   :  { %v1982_v31 = vmul.f32 %v1980_v58, %v1973_v27 }
0x182a   :  { %v1983_v29 = vadd.f32 %v1982_v31, %v1832_v28 }
0x182c   :  { %1985 = vrot.lane.b32.xlu1 %v1983_v29, %s2450_s14 }
0x189e   :  { %v1986_v40 = vpop.permute.xlu1 %1985 }
0x189f   :  { %v1989_v53 = vsel %vm1988_vm4, %v1986_v40, 0.0 }
0x18a0   :  { %1990 = vadd.xlane.f32.xlu0 %v1989_v53 }
0x1929   :  { %v1991_v61 = vpop.xlane.xlu0 %1990 }
0x192a   :  { %v1999_v7 = vadd.f32 %v2083_v10, %v1991_v61 }
0x192c   :  { %2001 = vst.msk [vmem:[%s3065_s11] sm:$0xf] %vm2000_vm5, %v1999_v7 }
0x192d   :  { %2006 = vsyncpa [#allocation4], 1 }
0x192e   :  { %2007 = vsyncpa [#allocation6], 1 }

</bundles_post_ra>
